<compile_context>
chip_gen: v7x
topology: tpu7x:2x2x1
jax: 0.10.0
libtpu: 0.0.40
codegen_flags: <defaults>
</compile_context>

<pallas_src>
import functools
import inspect

import jax
import jax.numpy as jnp
from jax.experimental import pallas as pl
from jax.experimental.pallas import tpu as pltpu

FEAT_C = 1408   # channel count of EfficientNet-B2 forward_features output
EMB_D = 512     # nn.Linear(1408, 512)


def _round_up(x, m):
    return ((x + m - 1) // m) * m


def _bf16_act_supported():
    """bf16 VPU/EUP exists on v6e/v7x; v5e (and older) lack it -> keep f32."""
    try:
        kind = jax.devices()[0].device_kind.lower()
    except Exception:
        return True
    return not any(tag in kind for tag in ("v2", "v3", "v4", "v5"))


def _pipeline_mode_supported():
    try:
        return (hasattr(pl, "Buffered")
                and "pipeline_mode" in inspect.signature(pl.BlockSpec).parameters)
    except Exception:
        return False


_PIPELINE_MODE_OK = _pipeline_mode_supported()


def _const_spec(shape):
    """BlockSpec for a grid-invariant (resident) operand; single-buffered if possible."""
    idx = lambda b, s: (0, 0)
    if _PIPELINE_MODE_OK:
        try:
            return pl.BlockSpec(shape, idx, pipeline_mode=pl.Buffered(1))
        except Exception:
            pass
    return pl.BlockSpec(shape, idx)


# ---------------------------------------------------------------------------
# Fused Pallas kernel: stem matmul + SiLU + global-average-pool + fc
# ---------------------------------------------------------------------------
def _fused_kernel(p_ref, sw_ref, sb_ref, fw_ref, fb_ref, o_ref, acc_ref,
                  *, s_true, s_pad, ts, use_bf16_act):
    s = pl.program_id(1)

    @pl.when(s == 0)
    def _():
        acc_ref[...] = jnp.zeros_like(acc_ref)

    # Stem: (TS, K) bf16 @ (K, 1408) bf16 -> f32 accumulate, f32 bias add.
    z = jnp.dot(p_ref[...], sw_ref[...], preferred_element_type=jnp.float32)
    z = z + sb_ref[...]

    # SiLU (EfficientNet activation): bf16 path on v6e/v7x, f32 on v5e.
    if use_bf16_act:
        zb = z.astype(jnp.bfloat16)
        act = (zb * jax.nn.sigmoid(zb)).astype(jnp.float32)
    else:
        act = z * jax.nn.sigmoid(z)

    # Partial sum for the global average pool.  Keep 8 sublanes so the per-tile
    # accumulation is full-vreg VPU adds + unmasked stores (no per-tile XLU
    # reduce to sublane 1).
    acc_ref[...] += jnp.sum(act.reshape(ts // 8, 8, FEAT_C), axis=0)

    # Finalize on the last spatial tile: padding correction, mean, Linear.
    @pl.when(s == pl.num_programs(1) - 1)
    def _():
        total = jnp.sum(acc_ref[...], axis=0, keepdims=True)          # (1, 1408)
        # Zero-padded patch rows each contributed exactly silu(stem_b); remove
        # them with a closed-form correction (runs once, not per tile).
        if s_pad > s_true:
            if use_bf16_act:
                bb = sb_ref[...].astype(jnp.bfloat16)
                pad_act = (bb * jax.nn.sigmoid(bb)).astype(jnp.float32)
            else:
                pad_act = sb_ref[...] * jax.nn.sigmoid(sb_ref[...])
            total = total - jnp.float32(s_pad - s_true) * pad_act
        pooled = total * jnp.float32(1.0 / s_true)                    # GAP
        emb = jnp.dot(pooled.astype(fw_ref.dtype), fw_ref[...],
                      preferred_element_type=jnp.float32) + fb_ref[...]
        o_ref[...] = emb                                              # (1, 512)


# ---------------------------------------------------------------------------
# Glue (im2col, parameter setup, forward)
# ---------------------------------------------------------------------------
def _im2col(x_nchw, kh=3, kw=3, stride=2):
    # (B, C, H, W) -> (B, H'*W', C*kh*kw)
    patches = jax.lax.conv_general_dilated_patches(
        x_nchw, filter_shape=(kh, kw), window_strides=(stride, stride),
        padding="SAME")                                   # (B, C*kh*kw, H', W')
    B, CKK, Ho, Wo = patches.shape
    return jnp.transpose(patches, (0, 2, 3, 1)).reshape(B, Ho * Wo, CKK)


def init_params(key, in_ch=3, kh=3, kw=3):
    k1, k2, k3 = jax.random.split(key, 3)
    K = in_ch * kh * kw                                   # 27
    stem_w = jax.random.normal(k1, (K, FEAT_C), jnp.float32) / jnp.sqrt(K)
    stem_b = jnp.zeros((1, FEAT_C), jnp.float32)
    # nn.Linear(1408, 512): PyTorch weight is (512, 1408); kernel uses transpose.
    fc_w = jax.random.normal(k2, (FEAT_C, EMB_D), jnp.float32) / jnp.sqrt(FEAT_C)
    fc_b = 0.01 * jax.random.normal(k3, (1, EMB_D), jnp.float32)
    return {"stem_w": stem_w, "stem_b": stem_b, "fc_w": fc_w, "fc_b": fc_b}


def forward_one(params, x_nchw):
    # Cast the image to bf16 BEFORE patch extraction: the (B, S, 27) patches
    # tensor that round-trips through HBM is then bf16 (half the wrapper
    # traffic).  Patch extraction is a pure rearrangement, so this is exactly
    # the same math as extracting in f32 and casting afterwards.
    patches = _im2col(x_nchw.astype(jnp.bfloat16))        # (B, S, 27) bf16
    B, S, K = patches.shape

    K_pad = _round_up(K, 8)                               # 27 -> 32
    TS = min(1024, _round_up(S, 8))                       # spatial tile (multiple of 8)
    S_pad = _round_up(S, TS)
    n_tiles = S_pad // TS

    # Zero-pad; padded rows are corrected in closed form inside the kernel.
    patches = jnp.pad(patches, ((0, 0), (0, S_pad - S), (0, K_pad - K)))
    stem_w = jnp.pad(params["stem_w"], ((0, K_pad - K), (0, 0))).astype(jnp.bfloat16)
    fc_w = params["fc_w"].astype(jnp.bfloat16)

    use_bf16_act = _bf16_act_supported()

    out = pl.pallas_call(
        functools.partial(_fused_kernel, s_true=S, s_pad=S_pad, ts=TS,
                          use_bf16_act=use_bf16_act),
        out_shape=jax.ShapeDtypeStruct((B, 1, EMB_D), jnp.float32),
        grid=(B, n_tiles),
        in_specs=[
            pl.BlockSpec((None, TS, K_pad), lambda b, s: (b, s, 0)),  # patches tile
            _const_spec((K_pad, FEAT_C)),                             # stem_w (resident)
            _const_spec((1, FEAT_C)),                                 # stem_b
            _const_spec((FEAT_C, EMB_D)),                             # fc_w (resident)
            _const_spec((1, EMB_D)),                                  # fc_b
        ],
        out_specs=pl.BlockSpec((None, 1, EMB_D), lambda b, s: (b, 0, 0)),
        scratch_shapes=[pltpu.VMEM((8, FEAT_C), jnp.float32)],        # pool accumulator
        compiler_params=pltpu.CompilerParams(
            dimension_semantics=("parallel", "arbitrary"),
            vmem_limit_bytes=32 * 1024 * 1024,
        ),
    )(patches, stem_w, params["stem_b"], fc_w, params["fc_b"])
    return out[:, 0, :]                                   # (B, 512)


def siamese_forward(params, x1, x2):
    # Both branches share weights -> one fused pass over the concatenated batch.
    B = x1.shape[0]
    out = forward_one(params, jnp.concatenate([x1, x2], axis=0))
    return out[:B], out[B:]


# ---------------------------------------------------------------------------
# Pure-JAX reference (same bf16 matmul operands) for a correctness check.
# ---------------------------------------------------------------------------
def _reference_forward_one(params, x_nchw):
    patches = _im2col(x_nchw)                             # (B, S, 27)
    B, S, K = patches.shape
    K_pad = _round_up(K, 8)
    pat = jnp.pad(patches, ((0, 0), (0, 0), (0, K_pad - K))).astype(jnp.bfloat16)
    sw = jnp.pad(params["stem_w"], ((0, K_pad - K), (0, 0))).astype(jnp.bfloat16)
    feats = jnp.einsum("bsk,kc->bsc", pat, sw,
                       preferred_element_type=jnp.float32) + params["stem_b"]
    feats = feats * jax.nn.sigmoid(feats)
    pooled = jnp.mean(feats, axis=1)                      # (B, 1408)
    return (jnp.dot(pooled.astype(jnp.bfloat16), params["fc_w"].astype(jnp.bfloat16),
                    preferred_element_type=jnp.float32) + params["fc_b"])


# ---------------------------------------------------------------------------
if __name__ == "__main__":
    key = jax.random.PRNGKey(0)
    kp, kx1, kx2 = jax.random.split(key, 3)
    params = init_params(kp)

    # PyTorch-convention NCHW inputs, small spatial size.
    x1 = jax.random.normal(kx1, (2, 3, 16, 16), jnp.float32)
    x2 = jax.random.normal(kx2, (2, 3, 16, 16), jnp.float32)

    out1, out2 = jax.jit(siamese_forward)(params, x1, x2)
    jax.block_until_ready((out1, out2))

    assert out1.shape == (2, EMB_D) and out2.shape == (2, EMB_D)
    assert out1.dtype == jnp.float32 and out2.dtype == jnp.float32

    # Correctness vs. pure-JAX reference (loose tol: bf16 matmul operands,
    # optionally bf16 SiLU on v6e/v7x).
    ref1 = _reference_forward_one(params, x1)
    ref2 = _reference_forward_one(params, x2)
    assert jnp.allclose(out1, ref1, rtol=5e-2, atol=5e-2)
    assert jnp.allclose(out2, ref2, rtol=5e-2, atol=5e-2)

    print("KERNEL_OK")
</pallas_src>

<mosaic_0001>
module attributes {stable_mosaic.version = 11 : i64} {
  func.func @_fused_kernel(%arg0: i32, %arg1: i32, %arg2: memref<1x64x32xbf16, #tpu.memory_space<vmem>>, %arg3: memref<32x1408xbf16, #tpu.memory_space<vmem>>, %arg4: memref<1x1408xf32, #tpu.memory_space<vmem>>, %arg5: memref<1408x512xbf16, #tpu.memory_space<vmem>>, %arg6: memref<1x512xf32, #tpu.memory_space<vmem>>, %arg7: memref<1x1x512xf32, #tpu.memory_space<vmem>>, %arg8: memref<8x1408xf32, #tpu.memory_space<vmem>>) attributes {dimension_semantics = [#tpu.dimension_semantics<parallel>, #tpu.dimension_semantics<arbitrary>], iteration_bounds = array<i64: 4, 1>, scalar_prefetch = 0 : i64, scratch_operands = 1 : i64, tpu.core_type = #tpu.core_type<tc>, window_params = [{transform_indices = @transform_0, window_bounds = array<i64: 1, 64, 32>}, {pipeline_mode = #tpu.pipeline_mode<synchronous>, transform_indices = @transform_1, window_bounds = array<i64: 32, 1408>}, {pipeline_mode = #tpu.pipeline_mode<synchronous>, transform_indices = @transform_2, window_bounds = array<i64: 1, 1408>}, {pipeline_mode = #tpu.pipeline_mode<synchronous>, transform_indices = @transform_3, window_bounds = array<i64: 1408, 512>}, {pipeline_mode = #tpu.pipeline_mode<synchronous>, transform_indices = @transform_4, window_bounds = array<i64: 1, 512>}, {transform_indices = @transform_5, window_bounds = array<i64: 1, 1, 512>}]} {
    %c0_i32 = arith.constant 0 : i32
    %0 = arith.cmpi eq, %arg1, %c0_i32 : i32
    %1 = arith.extui %0 : i1 to i32
    %c0_i32_0 = arith.constant 0 : i32
    %2 = arith.cmpi ne, %1, %c0_i32_0 : i32
    scf.if %2 {
      %cst_15 = arith.constant 0.000000e+00 : f32
      %26 = vector.broadcast %cst_15 : f32 to vector<8x1408xf32>
      %c0_16 = arith.constant 0 : index
      %c0_17 = arith.constant 0 : index
      %27 = vector.load %arg8[%c0_16, %c0_17] : memref<8x1408xf32, #tpu.memory_space<vmem>>, vector<8x1408xf32>
      tpu.vector_store %arg8[%c0_16, %c0_17], %26 {strides = array<i32>} : memref<8x1408xf32, #tpu.memory_space<vmem>>, vector<8x1408xf32>,
    } else {
    }
    %c0 = arith.constant 0 : index
    %c0_1 = arith.constant 0 : index
    %c0_2 = arith.constant 0 : index
    %3 = vector.load %arg2[%c0, %c0_1, %c0_2] : memref<1x64x32xbf16, #tpu.memory_space<vmem>>, vector<1x64x32xbf16>
    %4 = vector.shape_cast %3 : vector<1x64x32xbf16> to vector<64x32xbf16>
    %c0_3 = arith.constant 0 : index
    %c0_4 = arith.constant 0 : index
    %5 = vector.load %arg3[%c0_3, %c0_4] : memref<32x1408xbf16, #tpu.memory_space<vmem>>, vector<32x1408xbf16>
    %cst = arith.constant dense<0.000000e+00> : vector<64x1408xf32>
    %6 = tpu.matmul %4, %5, %cst {dimension_numbers = #tpu.dot_dimension_numbers<[1], [0], [0], [1], [0, 0, 1, 1], [], []>} : vector<64x32xbf16>, vector<32x1408xbf16>, vector<64x1408xf32> -> vector<64x1408xf32>
    %c0_5 = arith.constant 0 : index
    %c0_6 = arith.constant 0 : index
    %7 = vector.load %arg4[%c0_5, %c0_6] : memref<1x1408xf32, #tpu.memory_space<vmem>>, vector<1x1408xf32>
    %8 = vector.broadcast %7 : vector<1x1408xf32> to vector<64x1408xf32>
    %9 = arith.addf %6, %8 : vector<64x1408xf32>
    %10 = arith.truncf %9 : vector<64x1408xf32> to vector<64x1408xbf16>
    %11 = arith.negf %10 : vector<64x1408xbf16>
    %12 = math.exp %11 : vector<64x1408xbf16>
    %cst_7 = arith.constant 1.000000e+00 : bf16
    %13 = vector.broadcast %cst_7 : bf16 to vector<64x1408xbf16>
    %14 = arith.addf %13, %12 : vector<64x1408xbf16>
    %15 = arith.divf %13, %14 : vector<64x1408xbf16>
    %16 = arith.mulf %10, %15 : vector<64x1408xbf16>
    %17 = arith.extf %16 : vector<64x1408xbf16> to vector<64x1408xf32>
    %c0_8 = arith.constant 0 : index
    %c0_9 = arith.constant 0 : index
    %18 = vector.load %arg8[%c0_8, %c0_9] : memref<8x1408xf32, #tpu.memory_space<vmem>>, vector<8x1408xf32>
    %19 = vector.shape_cast %17 : vector<64x1408xf32> to vector<8x8x1408xf32>
    %cst_10 = arith.constant dense<0.000000e+00> : vector<8x1408xf32>
    %20 = vector.multi_reduction <add>, %19, %cst_10 [0] : vector<8x8x1408xf32> to vector<8x1408xf32>
    %21 = arith.addf %18, %20 : vector<8x1408xf32>
    %c0_11 = arith.constant 0 : index
    %c0_12 = arith.constant 0 : index
    %22 = vector.load %arg8[%c0_11, %c0_12] : memref<8x1408xf32, #tpu.memory_space<vmem>>, vector<8x1408xf32>
    tpu.vector_store %arg8[%c0_11, %c0_12], %21 {strides = array<i32>} : memref<8x1408xf32, #tpu.memory_space<vmem>>, vector<8x1408xf32>,
    %c0_i32_13 = arith.constant 0 : i32
    %23 = arith.cmpi eq, %arg1, %c0_i32_13 : i32
    %24 = arith.extui %23 : i1 to i32
    %c0_i32_14 = arith.constant 0 : i32
    %25 = arith.cmpi ne, %24, %c0_i32_14 : i32
    scf.if %25 {
      %c0_15 = arith.constant 0 : index
      %c0_16 = arith.constant 0 : index
      %26 = vector.load %arg8[%c0_15, %c0_16] : memref<8x1408xf32, #tpu.memory_space<vmem>>, vector<8x1408xf32>
      %cst_17 = arith.constant dense<0.000000e+00> : vector<1408xf32>
      %27 = vector.multi_reduction <add>, %26, %cst_17 [0] : vector<8x1408xf32> to vector<1408xf32>
      %28 = vector.shape_cast %27 : vector<1408xf32> to vector<1x1408xf32>
      %cst_18 = arith.constant 1.562500e-02 : f32
      %29 = vector.broadcast %cst_18 : f32 to vector<1x1408xf32>
      %30 = arith.mulf %28, %29 : vector<1x1408xf32>
      %31 = arith.truncf %30 : vector<1x1408xf32> to vector<1x1408xbf16>
      %c0_19 = arith.constant 0 : index
      %c0_20 = arith.constant 0 : index
      %32 = vector.load %arg5[%c0_19, %c0_20] : memref<1408x512xbf16, #tpu.memory_space<vmem>>, vector<1408x512xbf16>
      %cst_21 = arith.constant dense<0.000000e+00> : vector<1x512xf32>
      %33 = tpu.matmul %31, %32, %cst_21 {dimension_numbers = #tpu.dot_dimension_numbers<[1], [0], [0], [1], [0, 0, 1, 1], [], []>} : vector<1x1408xbf16>, vector<1408x512xbf16>, vector<1x512xf32> -> vector<1x512xf32>
      %c0_22 = arith.constant 0 : index
      %c0_23 = arith.constant 0 : index
      %34 = vector.load %arg6[%c0_22, %c0_23] : memref<1x512xf32, #tpu.memory_space<vmem>>, vector<1x512xf32>
      %35 = arith.addf %33, %34 : vector<1x512xf32>
      %c0_24 = arith.constant 0 : index
      %c0_25 = arith.constant 0 : index
      %c0_26 = arith.constant 0 : index
      %36 = vector.load %arg7[%c0_24, %c0_25, %c0_26] : memref<1x1x512xf32, #tpu.memory_space<vmem>>, vector<1x1x512xf32>
      %37 = vector.shape_cast %36 : vector<1x1x512xf32> to vector<1x512xf32>
      %38 = vector.shape_cast %35 : vector<1x512xf32> to vector<1x1x512xf32>
      tpu.vector_store %arg7[%c0_24, %c0_25, %c0_26], %38 {strides = array<i32>} : memref<1x1x512xf32, #tpu.memory_space<vmem>>, vector<1x1x512xf32>,
    } else {
    }
    return
  }
  func.func @transform_0(%arg0: i32, %arg1: i32) -> (i32, i32, i32) {
    %c0_i32 = arith.constant 0 : i32
    %c0_i32_0 = arith.constant 0 : i32
    return %arg0, %arg1, %c0_i32 : i32, i32, i32
  }
  func.func @transform_1(%arg0: i32, %arg1: i32) -> (i32, i32) {
    %c0_i32 = arith.constant 0 : i32
    %c0_i32_0 = arith.constant 0 : i32
    %c0_i32_1 = arith.constant 0 : i32
    return %c0_i32, %c0_i32_0 : i32, i32
  }
  func.func @transform_2(%arg0: i32, %arg1: i32) -> (i32, i32) {
    %c0_i32 = arith.constant 0 : i32
    %c0_i32_0 = arith.constant 0 : i32
    %c0_i32_1 = arith.constant 0 : i32
    return %c0_i32, %c0_i32_0 : i32, i32
  }
  func.func @transform_3(%arg0: i32, %arg1: i32) -> (i32, i32) {
    %c0_i32 = arith.constant 0 : i32
    %c0_i32_0 = arith.constant 0 : i32
    %c0_i32_1 = arith.constant 0 : i32
    return %c0_i32, %c0_i32_0 : i32, i32
  }
  func.func @transform_4(%arg0: i32, %arg1: i32) -> (i32, i32) {
    %c0_i32 = arith.constant 0 : i32
    %c0_i32_0 = arith.constant 0 : i32
    %c0_i32_1 = arith.constant 0 : i32
    return %c0_i32, %c0_i32_0 : i32, i32
  }
  func.func @transform_5(%arg0: i32, %arg1: i32) -> (i32, i32, i32) {
    %c0_i32 = arith.constant 0 : i32
    %c0_i32_0 = arith.constant 0 : i32
    %c0_i32_1 = arith.constant 0 : i32
    return %arg0, %c0_i32, %c0_i32_0 : i32, i32, i32
  }
}

</mosaic_0001>

<bundles_post_ra>
// kernel: siamese_forward.1
= control target key start
LH: loop header
LB: loop body
LE: loop exit
PB: predicated region body
PF: predicated region fallthrough
CT: control target
= control target key end

     0   :  { %s5698_s18 = smov 0   ;;  %s5700_s19 = smov 0   ;;  %s7470_s0 = inlined_call_operand.vmem [shape: bf16[4,64,32], index: 0, kind: input, shape index: {}]   ;;  %s7471_s1 = inlined_call_operand.vmem [shape: bf16[32,1408], index: 1, kind: input, shape index: {}]   ;;  %s7472_s2 = inlined_call_operand.vmem [shape: f32[1,1408], index: 2, kind: input, shape index: {}]   ;;  %s7473_s3 = inlined_call_operand.vmem [shape: bf16[1408,512], index: 3, kind: input, shape index: {}]   ;;  %s7474_s4 = inlined_call_operand.vmem [shape: f32[1,512], index: 4, kind: input, shape index: {}]   ;;  %s7475_s5 = inlined_call_operand.vmem [shape: f32[4,1,512], index: 5, kind: output, shape index: {}]  }
   0x1   :  { %s5702_s20 = smov 0  }
   0x2 LB: > { %s27_s21 = sadd.s32 1, %s5660_s19  ;;  %p4361_p0 = scmp.ge.s32.totalorder %s5664_s20, 1  ;;  %s5664_s20 = sphi %s5702_s20, %s15_s20   ;;  %s5660_s19 = sphi %s5700_s19, %s7498_s19   ;;  %s5656_s18 = sphi %s5698_s18, %s7497_s18  }
   0x3   : > { %p29_p1 = scmp.ge.s32.totalorder %s27_s21, 4  ;;  %p206_p2 = scmp.lt.s32.totalorder %s5664_s20, 5 }
   0x5   : > { %s7500_s21 = smov (%p29_p1, %s27_s21), 0  ;;  %p207_p3 = pnand %p4361_p0, %p206_p2 }
   0x7   : > { %210 = sbr.rel (%p207_p3) target bundleno = 835 (0x343), region = 40 }
   0xe   : > { %v4902_v0 = vld [vmem:[%s7471_s1 + $0x4] ss:$44 sps:$4 sm:$0xff]   ;;  %p238_p4 = scmp.lt.s32.totalorder %s5656_s18, 3  ;;  %v4904_v1 = vld [vmem:[%s7471_s1] ss:$44 sps:$4 sm:$0xff]   ;;  %v7478_v2 = vmov 0  }
   0xf   : > { %536 = vmatprep.mubr.bf16.mxu0 %v7478_v2  ;;  %609 = vmatprep.mubr.bf16.mxu1 %v7478_v2  ;;  %v4905_v3 = vld [vmem:[%s7471_s1 + $0x5c] ss:$44 sps:$4 sm:$0xff]   ;;  %v4907_v4 = vld [vmem:[%s7471_s1 + $0x58] ss:$44 sps:$4 sm:$0xff]   ;;  %v4915_v8 = vld [vmem:[%s7471_s1 + $0x60] ss:$44 sps:$4 sm:$0xff]  }
  0x10   : > { %504 = vmatprep.subr.bf16.mxu0 %v4902_v0  ;;  %s7502_s18 = smov (!%p238_p4, %s5656_s18), 3  ;;  %v4909_v5 = vld [vmem:[%s7471_s1 + $0xc] ss:$44 sps:$4 sm:$0xff]   ;;  %v4911_v6 = vld [vmem:[%s7471_s1 + $0x8] ss:$44 sps:$4 sm:$0xff]   ;;  %vm491_vm0 = vcmask 261120  }
  0x11   : > { %505 = vmatpush1.bf16.msra.mxu0 %v4904_v1  ;;  %s4813_s9 = sshll.u32 %s7502_s18, 5  ;;  %v4912_v7 = vld [vmem:[%s7471_s1 + $0x64] ss:$44 sps:$4 sm:$0xff]   ;;  %577 = vmatprep.subr.bf16.mxu1 %v4909_v5  ;;  %v4920_v11 = vld [vmem:[%s7471_s1 + $0x14] ss:$44 sps:$4 sm:$0xff]  }
  0x12   : > { %506 = vmatprep.subr.bf16.mxu0 %v4905_v3  ;;  %s5745_s14 = scalar_lea.vmem %s7470_s0, %s4813_s9  ;;  %578 = vmatpush1.bf16.msra.mxu1 %v4911_v6  ;;  %v4918_v10 = vld [vmem:[%s7471_s1 + $0x10] ss:$44 sps:$4 sm:$0xff]   ;;  %v4921_v12 = vld [vmem:[%s7471_s1 + $0x68] ss:$44 sps:$4 sm:$0xff]   ;;  %v4923_v13 = vld [vmem:[%s7471_s1 + $0x6c] ss:$44 sps:$4 sm:$0xff]  }
  0x13   : > { %v5751_v9 = vld [vmem:[%s5745_s14] sm:$0xff]   ;;  %579 = vmatprep.subr.bf16.mxu1 %v4912_v7  ;;  %v4926_v15 = vld [vmem:[%s7471_s1 + $0x1c] ss:$44 sps:$4 sm:$0xff]   ;;  %v4916_v21 = vld [vmem:[%s5745_s14 + $0x10] sm:$0xff]  }
  0x14   : > { %v4924_v14 = vld [vmem:[%s7471_s1 + $0x18] ss:$44 sps:$4 sm:$0xff]   ;;  %v4914_v16 = vld [vmem:[%s5745_s14 + $0x8] sm:$0xff]   ;;  %v4929_v17 = vld [vmem:[%s7471_s1 + $0x74] ss:$44 sps:$4 sm:$0xff]  }
  0x15   : > { %507 = vmatpush1.bf16.msra.mxu0 %v4907_v4  ;;  %v4932_v18 = vld [vmem:[%s7471_s1 + $0x24] ss:$44 sps:$4 sm:$0xff]   ;;  %v4936_v20 = vld [vmem:[%s7471_s1 + $0x28] ss:$44 sps:$4 sm:$0xff]   ;;  %v4917_v22 = vld [vmem:[%s5745_s14 + $0x18] sm:$0xff]   ;;  %s4364_s14 = sshll.u32 %s7502_s18, 2 }
  0x16   : > { %580 = vmatpush1.bf16.msra.mxu1 %v4915_v8  ;;  %650 = vmatprep.subr.bf16.mxu0 %v4920_v11  ;;  %v4927_v19 = vld [vmem:[%s7471_s1 + $0x70] ss:$44 sps:$4 sm:$0xff]   ;;  %v4930_v23 = vld [vmem:[%s7471_s1 + $0x20] ss:$44 sps:$4 sm:$0xff]   ;;  %v4933_v25 = vld [vmem:[%s7471_s1 + $0x78] ss:$44 sps:$4 sm:$0xff]   ;;  %s250_s27 = scalar_lea.vmem %s7475_s5, %s4364_s14 }
  0x17   : > { %723 = vmatprep.subr.bf16.mxu1 %v4926_v15  ;;  %v4935_v24 = vld [vmem:[%s7471_s1 + $0x7c] ss:$44 sps:$4 sm:$0xff]   ;;  %v4937_v26 = vld [vmem:[%s7471_s1 + $0x80] ss:$44 sps:$4 sm:$0xff]   ;;  %v4940_v27 = vld [vmem:[%s7473_s3 + $0x4] ss:$16 sps:$4 sm:$0xff]  }
  0x18   : > { %4391 = vmatmul.mubr.msk.bf16.vlgmr.msra.gmra.mrb[0].mxu0 %vm491_vm0, %v5751_v9  ;;  %v4943_v28 = vld [vmem:[%s7473_s3 + $0xc] ss:$16 sps:$4 sm:$0xff]   ;;  %v4938_v29 = vld [vmem:[%s7473_s3] ss:$16 sps:$4 sm:$0xff]   ;;  %v4941_v30 = vld [vmem:[%s7473_s3 + $0x8] ss:$16 sps:$4 sm:$0xff]  }
  0x19   : > { %546 = vmatprep.mubr.bf16.mxu0 %v7478_v2  ;;  %4395 = vmatmul.mubr.msk.bf16.vlgmr.msra.gmra.mrb[0].mxu1 %vm491_vm0, %v5751_v9  ;;  %v4946_v31 = vld [vmem:[%s7473_s3 + $0x24] ss:$16 sps:$4 sm:$0xff]   ;;  %v4949_v32 = vld [vmem:[%s7473_s3 + $0x2c] ss:$16 sps:$4 sm:$0xff]   ;;  %v4944_v33 = vld [vmem:[%s7473_s3 + $0x20] ss:$16 sps:$4 sm:$0xff]  }
  0x1a   : > { %651 = vmatpush1.bf16.msra.mxu0 %v4918_v10  ;;  %619 = vmatprep.mubr.bf16.mxu1 %v7478_v2  ;;  %v4947_v34 = vld [vmem:[%s7473_s3 + $0x28] ss:$16 sps:$4 sm:$0xff]   ;;  %v4952_v35 = vld [vmem:[%s7473_s3 + $0x44] ss:$16 sps:$4 sm:$0xff]   ;;  %v4955_v36 = vld [vmem:[%s7473_s3 + $0x4c] ss:$16 sps:$4 sm:$0xff]  }
  0x1b   : > { %652 = vmatprep.subr.bf16.mxu0 %v4923_v13  ;;  %724 = vmatpush1.bf16.msra.mxu1 %v4924_v14  ;;  %v4950_v37 = vld [vmem:[%s7473_s3 + $0x40] ss:$16 sps:$4 sm:$0xff]   ;;  %v4953_v38 = vld [vmem:[%s7473_s3 + $0x48] ss:$16 sps:$4 sm:$0xff]   ;;  %v4958_v39 = vld [vmem:[%s7473_s3 + $0x64] ss:$16 sps:$4 sm:$0xff]  }
  0x1c   : > { %725 = vmatprep.subr.bf16.mxu1 %v4929_v17  ;;  %v4961_v40 = vld [vmem:[%s7473_s3 + $0x6c] ss:$16 sps:$4 sm:$0xff]   ;;  %v4956_v41 = vld [vmem:[%s7473_s3 + $0x60] ss:$16 sps:$4 sm:$0xff]   ;;  %v4959_v42 = vld [vmem:[%s7473_s3 + $0x68] ss:$16 sps:$4 sm:$0xff]  }
  0x1d   : > { %v4964_v43 = vld [vmem:[%s7473_s3 + $0x84] ss:$16 sps:$4 sm:$0xff]   ;;  %v4967_v44 = vld [vmem:[%s7473_s3 + $0x8c] ss:$16 sps:$4 sm:$0xff]   ;;  %v4962_v45 = vld [vmem:[%s7473_s3 + $0x80] ss:$16 sps:$4 sm:$0xff]  }
  0x1e   : > { %653 = vmatpush1.bf16.msra.mxu0 %v4921_v12  ;;  %v4965_v46 = vld [vmem:[%s7473_s3 + $0x88] ss:$16 sps:$4 sm:$0xff]   ;;  %v4970_v47 = vld [vmem:[%s7473_s3 + $0xa4] ss:$16 sps:$4 sm:$0xff]   ;;  %v4973_v48 = vld [vmem:[%s7473_s3 + $0xac] ss:$16 sps:$4 sm:$0xff]  }
  0x1f   : > { %796 = vmatprep.subr.bf16.mxu0 %v4932_v18  ;;  %726 = vmatpush1.bf16.msra.mxu1 %v4927_v19  ;;  %v4968_v49 = vld [vmem:[%s7473_s3 + $0xa0] ss:$16 sps:$4 sm:$0xff]   ;;  %v4971_v50 = vld [vmem:[%s7473_s3 + $0xa8] ss:$16 sps:$4 sm:$0xff]   ;;  %v4976_v51 = vld [vmem:[%s7473_s3 + $0xc4] ss:$16 sps:$4 sm:$0xff]  }
  0x20   : > { %4392 = vmatmul.mubr.msk.bf16.gmra.mrb[4].mxu0 %vm491_vm0, %v4914_v16  ;;  %4820 = vmatprep.subr.bf16.mxu1 %v4936_v20  ;;  %v4979_v52 = vld [vmem:[%s7473_s3 + $0xcc] ss:$16 sps:$4 sm:$0xff]   ;;  %v4974_v53 = vld [vmem:[%s7473_s3 + $0xc0] ss:$16 sps:$4 sm:$0xff]   ;;  %v4977_v54 = vld [vmem:[%s7473_s3 + $0xc8] ss:$16 sps:$4 sm:$0xff]  }
  0x21   : > { %556 = vmatprep.mubr.bf16.mxu0 %v7478_v2  ;;  %4396 = vmatmul.mubr.msk.bf16.gmra.mrb[4].mxu1 %vm491_vm0, %v4914_v16  ;;  %v4982_v55 = vld [vmem:[%s7473_s3 + $0xe4] ss:$16 sps:$4 sm:$0xff]   ;;  %v4985_v56 = vld [vmem:[%s7473_s3 + $0xec] ss:$16 sps:$4 sm:$0xff]   ;;  %v4980_v57 = vld [vmem:[%s7473_s3 + $0xe0] ss:$16 sps:$4 sm:$0xff]  }
  0x22   : > { %629 = vmatprep.mubr.bf16.mxu1 %v7478_v2  ;;  %v4983_v58 = vld [vmem:[%s7473_s3 + $0xe8] ss:$16 sps:$4 sm:$0xff]   ;;  %v4988_v59 = vld [vmem:[%s7473_s3 + $0x104] ss:$16 sps:$4 sm:$0xff]   ;;  %v4991_v60 = vld [vmem:[%s7473_s3 + $0x10c] ss:$16 sps:$4 sm:$0xff]  }
  0x23   : > { %v4986_v61 = vld [vmem:[%s7473_s3 + $0x100] ss:$16 sps:$4 sm:$0xff]   ;;  %v4989_v62 = vld [vmem:[%s7473_s3 + $0x108] ss:$16 sps:$4 sm:$0xff]   ;;  %v4994_v63 = vld [vmem:[%s7473_s3 + $0x124] ss:$16 sps:$4 sm:$0xff]  }
  0x24   : > { %v4997_v0 = vld [vmem:[%s7473_s3 + $0x12c] ss:$16 sps:$4 sm:$0xff]   ;;  %v4992_v1 = vld [vmem:[%s7473_s3 + $0x120] ss:$16 sps:$4 sm:$0xff]   ;;  %v4995_v3 = vld [vmem:[%s7473_s3 + $0x128] ss:$16 sps:$4 sm:$0xff]  }
  0x25   : > { %v5000_v4 = vld [vmem:[%s7473_s3 + $0x144] ss:$16 sps:$4 sm:$0xff]   ;;  %v5003_v5 = vld [vmem:[%s7473_s3 + $0x14c] ss:$16 sps:$4 sm:$0xff]   ;;  %v4998_v6 = vld [vmem:[%s7473_s3 + $0x140] ss:$16 sps:$4 sm:$0xff]  }
  0x26   : > { %v5001_v7 = vld [vmem:[%s7473_s3 + $0x148] ss:$16 sps:$4 sm:$0xff]   ;;  %v5006_v8 = vld [vmem:[%s7473_s3 + $0x164] ss:$16 sps:$4 sm:$0xff]   ;;  %v5004_v10 = vld [vmem:[%s7473_s3 + $0x160] ss:$16 sps:$4 sm:$0xff]  }
  0x27   : > { %v5007_v11 = vld [vmem:[%s7473_s3 + $0x168] ss:$16 sps:$4 sm:$0xff]   ;;  %v5012_v12 = vld [vmem:[%s7473_s3 + $0x184] ss:$16 sps:$4 sm:$0xff]   ;;  %v5015_v13 = vld [vmem:[%s7473_s3 + $0x18c] ss:$16 sps:$4 sm:$0xff]  }
  0x28   : > { %4393 = vmatmul.mubr.msk.bf16.gmra.mrb[8].mxu0 %vm491_vm0, %v4916_v21  ;;  %v5010_v14 = vld [vmem:[%s7473_s3 + $0x180] ss:$16 sps:$4 sm:$0xff]   ;;  %v5013_v15 = vld [vmem:[%s7473_s3 + $0x188] ss:$16 sps:$4 sm:$0xff]   ;;  %v5021_v17 = vld [vmem:[%s7473_s3 + $0x1ac] ss:$16 sps:$4 sm:$0xff]  }
  0x29   : > { %566 = vmatprep.mubr.bf16.mxu0 %v7478_v2  ;;  %4397 = vmatmul.mubr.msk.bf16.gmra.mrb[8].mxu1 %vm491_vm0, %v4916_v21  ;;  %v5016_v18 = vld [vmem:[%s7473_s3 + $0x1a0] ss:$16 sps:$4 sm:$0xff]   ;;  %v5019_v19 = vld [vmem:[%s7473_s3 + $0x1a8] ss:$16 sps:$4 sm:$0xff]  }
  0x2a   : > { %639 = vmatprep.mubr.bf16.mxu1 %v7478_v2 }
  0x30   : > { %4394 = vmatmul.mubr.msk.bf16.gmra.mrb[12].mxu0 %vm491_vm0, %v4917_v22 }
  0x31   : > { %682 = vmatprep.mubr.bf16.mxu0 %v7478_v2  ;;  %4398 = vmatmul.mubr.msk.bf16.gmra.mrb[12].mxu1 %vm491_vm0, %v4917_v22 }
  0x32   : > { %755 = vmatprep.mubr.bf16.mxu1 %v7478_v2 }
  0x38   : > { %4399 = vmatmul.mubr.msk.bf16.vlgmr.msra.gmra.mrb[16].mxu0 %vm491_vm0, %v5751_v9 }
  0x39   : > { %692 = vmatprep.mubr.bf16.mxu0 %v7478_v2  ;;  %797 = vmatpush1.bf16.msra.mxu0 %v4930_v23  ;;  %v5025_v23 = vld [vmem:[%s7473_s3 + $0x1c8] ss:$16 sps:$4 sm:$0xff]  }
  0x3a   : > { %798 = vmatprep.subr.bf16.mxu0 %v4935_v24  ;;  %4403 = vmatmul.mubr.msk.bf16.vlgmr.msra.gmra.mrb[16].mxu1 %vm491_vm0, %v5751_v9  ;;  %v5030_v24 = vld [vmem:[%s7473_s3 + $0x1e4] ss:$16 sps:$4 sm:$0xff]  }
  0x3b   : > { %765 = vmatprep.mubr.bf16.mxu1 %v7478_v2  ;;  %4821 = vmatpush3.bf16.msra.mxu1 %v4936_v20  ;;  %v5024_v20 = vld [vmem:[%s7473_s3 + $0x1c4] ss:$16 sps:$4 sm:$0xff]  }
  0x3c   : > { %4822 = vmatprep.subr.bf16.mxu1 %v4937_v26 }
  0x3d   : > { %799 = vmatpush1.bf16.msra.mxu0 %v4933_v25  ;;  %v5033_v25 = vld [vmem:[%s7473_s3 + $0x1ec] ss:$16 sps:$4 sm:$0xff]  }
  0x3e   : > { %3764 = vmatprep.subr.bf16.mxu0 %v4940_v27  ;;  %v5031_v27 = vld [vmem:[%s7473_s3 + $0x1e8] ss:$16 sps:$4 sm:$0xff]  }
  0x3f   : > { %4823 = vmatpush3.bf16.msra.mxu1 %v4937_v26  ;;  %v5028_v26 = vld [vmem:[%s7473_s3 + $0x1e0] ss:$16 sps:$4 sm:$0xff]  }
  0x40   : > { %4400 = vmatmul.mubr.msk.bf16.gmra.mrb[20].mxu0 %vm491_vm0, %v4914_v16  ;;  %4010 = vmatprep.subr.bf16.mxu1 %v4943_v28  ;;  %v5036_v28 = vld [vmem:[%s7473_s3 + $0x204] ss:$16 sps:$4 sm:$0xff]  }
  0x41   : > { %702 = vmatprep.mubr.bf16.mxu0 %v7478_v2 }
  0x42   : > { %4404 = vmatmul.mubr.msk.bf16.gmra.mrb[20].mxu1 %vm491_vm0, %v4914_v16 }
  0x43   : > { %775 = vmatprep.mubr.bf16.mxu1 %v7478_v2 }
  0x48   : > { %4401 = vmatmul.mubr.msk.bf16.gmra.mrb[24].mxu0 %vm491_vm0, %v4916_v21 }
  0x49   : > { %712 = vmatprep.mubr.bf16.mxu0 %v7478_v2 }
  0x4a   : > { %4405 = vmatmul.mubr.msk.bf16.gmra.mrb[24].mxu1 %vm491_vm0, %v4916_v21 }
  0x4b   : > { %785 = vmatprep.mubr.bf16.mxu1 %v7478_v2 }
  0x50   : > { %4402 = vmatmul.mubr.msk.bf16.gmra.mrb[28].mxu0 %vm491_vm0, %v4917_v22 }
  0x51   : > { %828 = vmatprep.mubr.bf16.mxu0 %v7478_v2 }
  0x52   : > { %4406 = vmatmul.mubr.msk.bf16.gmra.mrb[28].mxu1 %vm491_vm0, %v4917_v22 }
  0x53   : > { %4824 = vmatprep.mubr.msk.bf16.mxu1 %vm491_vm0, %v5751_v9 }
  0x58   : > { %4407 = vmatmul.mubr.msk.bf16.vlgmr.msra.gmra.mrb[32].mxu0 %vm491_vm0, %v5751_v9  ;;  %v5009_v9 = vld [vmem:[%s7473_s3 + $0x16c] ss:$16 sps:$4 sm:$0xff]  }
  0x59   : > { %838 = vmatprep.mubr.bf16.mxu0 %v7478_v2  ;;  %3765 = vmatpush1.bf16.msra.mxu0 %v4938_v29  ;;  %v5039_v29 = vld [vmem:[%s7473_s3 + $0x20c] ss:$16 sps:$4 sm:$0xff]  }
  0x5a   : > { %4825 = vmatmul.mubr.msk.bf16.vlgmr.msra.gmra.mrb[32].mxu1 %vm491_vm0, %v4914_v16  ;;  %3766 = vmatprep.subr.bf16.mxu0 %v4946_v31 }
  0x5b   : > { %4828 = vmatprep.mubr.msk.bf16.mxu1 %vm491_vm0, %v4916_v21  ;;  %4011 = vmatpush1.bf16.msra.mxu1 %v4941_v30  ;;  %v7476_v30 = vlaneseq }
  0x5c   : > { %4012 = vmatprep.subr.bf16.mxu1 %v4949_v32 }
  0x5d   : > { %3767 = vmatpush1.bf16.msra.mxu0 %v4944_v33  ;;  %v6045_v31 = vshrl.u32 %v7476_v30, 7  ;;  %v6053_v33 = vld [vmem:[%s7472_s2] sm:$0xff] }
  0x5e   : > { %3768 = vmatprep.subr.bf16.mxu0 %v4952_v35 }
  0x5f   : > { %4013 = vmatpush1.bf16.msra.mxu1 %v4947_v34  ;;  %7482 = vst [vmem:[#allocation3_spill] sm:$0xff] %v6045_v31  ;;  %v6048_v32 = vsub.s32 0, %v6045_v31  ;;  %v6056_v34 = vsub.s32 1, %v6045_v31  ;;  %v6059_v35 = vsub.s32 2, %v6045_v31 }
  0x60   : > { %4408 = vmatmul.mubr.msk.bf16.gmra.mrb[36].mxu0 %vm491_vm0, %v4914_v16  ;;  %4014 = vmatprep.subr.bf16.mxu1 %v4955_v36  ;;  %v5018_v16 = vld [vmem:[%s7473_s3 + $0x1a4] ss:$16 sps:$4 sm:$0xff]   ;;  %v7477_v36 = vsub.s32 3, %v6045_v31 }
  0x61   : > { %848 = vmatprep.mubr.bf16.mxu0 %v7478_v2  ;;  %3769 = vmatpush1.bf16.msra.mxu0 %v4950_v37  ;;  %v6064_v37 = vrot.slane %v6053_v33, %v6048_v32 }
  0x62   : > { %4829 = vmatmul.mubr.msk.bf16.gmra.mrb[36].mxu1 %vm491_vm0, %v4917_v22  ;;  %3770 = vmatprep.subr.bf16.mxu0 %v4958_v39  ;;  %v6068_v39 = vrot.slane %v6053_v33, %v6056_v34 }
  0x63   : > { %4015 = vmatpush1.bf16.msra.mxu1 %v4953_v38 }
  0x64   : > { %4016 = vmatprep.subr.bf16.mxu1 %v4961_v40  ;;  %v6072_v40 = vrot.slane %v6053_v33, %v6059_v35 }
  0x65   : > { %3771 = vmatpush1.bf16.msra.mxu0 %v4956_v41 }
  0x66   : > { %3772 = vmatprep.subr.bf16.mxu0 %v4964_v43 }
  0x67   : > { %4017 = vmatpush1.bf16.msra.mxu1 %v4959_v42  ;;  %v6077_v42 = vrot.slane %v6053_v33, %v7477_v36 }
  0x68   : > { %4409 = vmatmul.mubr.msk.bf16.gmra.mrb[40].mxu0 %vm491_vm0, %v4916_v21  ;;  %4018 = vmatprep.subr.bf16.mxu1 %v4967_v44  ;;  %v5027_v21 = vld [vmem:[%s7473_s3 + $0x1cc] ss:$16 sps:$4 sm:$0xff]  }
  0x69   : > { %858 = vmatprep.mubr.bf16.mxu0 %v7478_v2  ;;  %3773 = vmatpush1.bf16.msra.mxu0 %v4962_v45 }
  0x6a   : > { %3774 = vmatprep.subr.bf16.mxu0 %v4970_v47 }
  0x6b   : > { %4019 = vmatpush1.bf16.msra.mxu1 %v4965_v46 }
  0x6c   : > { %4020 = vmatprep.subr.bf16.mxu1 %v4973_v48 }
  0x6d   : > { %3775 = vmatpush1.bf16.msra.mxu0 %v4968_v49 }
  0x6e   : > { %3776 = vmatprep.subr.bf16.mxu0 %v4976_v51 }
  0x6f   : > { %4021 = vmatpush1.bf16.msra.mxu1 %v4971_v50 }
  0x70   : > { %4410 = vmatmul.mubr.msk.bf16.gmra.mrb[44].mxu0 %vm491_vm0, %v4917_v22  ;;  %4022 = vmatprep.subr.bf16.mxu1 %v4979_v52  ;;  %v5022_v22 = vld [vmem:[%s7473_s3 + $0x1c0] ss:$16 sps:$4 sm:$0xff]  }
  0x71   : > { %3777 = vmatpush1.bf16.msra.mxu0 %v4974_v53 }
  0x72   : > { %3778 = vmatprep.subr.bf16.mxu0 %v4982_v55 }
  0x73   : > { %4023 = vmatpush1.bf16.msra.mxu1 %v4977_v54 }
  0x74   : > { %4024 = vmatprep.subr.bf16.mxu1 %v4985_v56 }
  0x75   : > { %3779 = vmatpush1.bf16.msra.mxu0 %v4980_v57 }
  0x76   : > { %3780 = vmatprep.subr.bf16.mxu0 %v4988_v59 }
  0x77   : > { %4025 = vmatpush1.bf16.msra.mxu1 %v4983_v58 }
  0x78   : > { %4026 = vmatprep.subr.bf16.mxu1 %v4991_v60 }
  0x79   : > { %3781 = vmatpush1.bf16.msra.mxu0 %v4986_v61 }
  0x7a   : > { %3782 = vmatprep.subr.bf16.mxu0 %v4994_v63 }
  0x7b   : > { %4027 = vmatpush1.bf16.msra.mxu1 %v4989_v62 }
  0x7c   : > { %4028 = vmatprep.subr.bf16.mxu1 %v4997_v0 }
  0x7d   : > { %3783 = vmatpush1.bf16.msra.mxu0 %v4992_v1 }
  0x7e   : > { %3784 = vmatprep.subr.bf16.mxu0 %v5000_v4 }
  0x7f   : > { %4029 = vmatpush1.bf16.msra.mxu1 %v4995_v3 }
  0x80   : > { %4030 = vmatprep.subr.bf16.mxu1 %v5003_v5 }
  0x81   : > { %3785 = vmatpush1.bf16.msra.mxu0 %v4998_v6 }
  0x82   : > { %3786 = vmatprep.subr.bf16.mxu0 %v5006_v8 }
  0x83   : > { %4031 = vmatpush1.bf16.msra.mxu1 %v5001_v7 }
  0x84   : > { %4032 = vmatprep.subr.bf16.mxu1 %v5009_v9 }
  0x85   : > { %3787 = vmatpush1.bf16.msra.mxu0 %v5004_v10 }
  0x86   : > { %3788 = vmatprep.subr.bf16.mxu0 %v5012_v12 }
  0x87   : > { %4033 = vmatpush1.bf16.msra.mxu1 %v5007_v11 }
  0x88   : > { %4034 = vmatprep.subr.bf16.mxu1 %v5015_v13 }
  0x89   : > { %3789 = vmatpush1.bf16.msra.mxu0 %v5010_v14 }
  0x8a   : > { %3790 = vmatprep.subr.bf16.mxu0 %v5018_v16 }
  0x8b   : > { %4035 = vmatpush1.bf16.msra.mxu1 %v5013_v15 }
  0x8c   : > { %4036 = vmatprep.subr.bf16.mxu1 %v5021_v17 }
  0x8d   : > { %3791 = vmatpush1.bf16.msra.mxu0 %v5016_v18 }
  0x8e   : > { %3792 = vmatprep.subr.bf16.mxu0 %v5024_v20 }
  0x8f   : > { %4037 = vmatpush1.bf16.msra.mxu1 %v5019_v19 }
  0x90   : > { %4038 = vmatprep.subr.bf16.mxu1 %v5027_v21 }
  0x91   : > { %3793 = vmatpush1.bf16.msra.mxu0 %v5022_v22 }
  0x92   : > { %3794 = vmatprep.subr.bf16.mxu0 %v5030_v24 }
  0x93   : > { %4039 = vmatpush1.bf16.msra.mxu1 %v5025_v23 }
  0x94   : > { %4040 = vmatprep.subr.bf16.mxu1 %v5033_v25 }
  0x95   : > { %3795 = vmatpush1.bf16.msra.mxu0 %v5028_v26 }
  0x96   : > { %3805 = vmatprep.subr.bf16.mxu0 %v5036_v28 }
  0x97   : > { %4041 = vmatpush1.bf16.msra.mxu1 %v5031_v27 }
  0x98   : > { %4051 = vmatprep.subr.bf16.mxu1 %v5039_v29 }
  0xeb   : > { %v538_v38 = vpop.f32.mrb[0].mxu0 }
  0xec   : > { %v540_v41 = vpop.f32.mrb[1].mxu0  ;;  %v539_v44 = vadd.f32 %v538_v38, %v6064_v37  ;;  %v611_v47 = vpop.f32.mrb[0].mxu1 }
  0xed   : > { %v542_v43 = vpop.f32.mrb[2].mxu0  ;;  %v541_v48 = vadd.f32 %v540_v41, %v6068_v39  ;;  %v612_v50 = vadd.f32 %v611_v47, %v6072_v40  ;;  %v613_v51 = vpop.f32.mrb[1].mxu1 }
  0xee   : > { %v543_v45 = vadd.f32 %v542_v43, %v6064_v37  ;;  %v544_v46 = vpop.f32.mrb[3].mxu0  ;;  %v614_v53 = vadd.f32 %v613_v51, %v6077_v42  ;;  %v615_v54 = vpop.f32.mrb[2].mxu1 }
  0xef   : > { %v545_v49 = vadd.f32 %v544_v46, %v6068_v39  ;;  %v616_v56 = vadd.f32 %v615_v54, %v6072_v40  ;;  %v617_v57 = vpop.f32.mrb[3].mxu1 }
  0xf0   : > { %v6084_v52 = vpack.c.bf16 %v543_v45, %v539_v44  ;;  %v618_v59 = vadd.f32 %v617_v57, %v6077_v42  ;;  %v322_v44 = vsub.s32 4, %v6045_v31 }
  0xf1   : > { %v6087_v55 = vpack.c.bf16 %v545_v49, %v541_v48  ;;  %v6093_v62 = vpack.c.bf16 %v616_v56, %v612_v50 }
  0xf2   : > { %v4415_v58 = vmul.bf16 3216621497, %v6084_v52  ;;  %v6095_v0 = vpack.c.bf16 %v618_v59, %v614_v53 }
  0xf3   : > { %v4416_v60 = vmul.bf16 3216621497, %v6087_v55  ;;  %v548_v61 = vpop.f32.mrb[4].mxu0  ;;  %v4417_v3 = vmul.bf16 3216621497, %v6093_v62 }
  0xf4   : > { %5466 = vpow.bf16 %v4415_v58  ;;  %v550_v63 = vpop.f32.mrb[5].mxu0  ;;  %v549_v4 = vadd.f32 %v548_v61, %v6064_v37  ;;  %v4418_v7 = vmul.bf16 3216621497, %v6095_v0  ;;  %v621_v8 = vpop.f32.mrb[4].mxu1  ;;  %v326_v61 = vsub.s32 5, %v6045_v31 }
  0xf5   : > { %5468 = vpow.bf16 %v4416_v60  ;;  %v552_v1 = vpop.f32.mrb[6].mxu0  ;;  %v551_v9 = vadd.f32 %v550_v63, %v6068_v39  ;;  %v622_v11 = vadd.f32 %v621_v8, %v6072_v40  ;;  %v623_v12 = vpop.f32.mrb[5].mxu1 }
  0xf6   : > { %v553_v5 = vadd.f32 %v552_v1, %v6064_v37  ;;  %v554_v6 = vpop.f32.mrb[7].mxu0  ;;  %5470 = vpow.bf16 %v4417_v3  ;;  %v624_v14 = vadd.f32 %v623_v12, %v6077_v42  ;;  %v625_v15 = vpop.f32.mrb[6].mxu1 }
  0xf7   : > { %v555_v10 = vadd.f32 %v554_v6, %v6068_v39  ;;  %5472 = vpow.bf16 %v4418_v7  ;;  %v626_v17 = vadd.f32 %v625_v15, %v6072_v40  ;;  %v627_v18 = vpop.f32.mrb[7].mxu1  ;;  %v6141_v15 = vrot.slane %v6053_v33, %v322_v44 }
  0xf8   : > { %v6104_v13 = vpack.c.bf16 %v553_v5, %v549_v4  ;;  %v628_v20 = vadd.f32 %v627_v18, %v6077_v42 }
  0xf9   : > { %v6107_v16 = vpack.c.bf16 %v555_v10, %v551_v9  ;;  %v6113_v23 = vpack.c.bf16 %v626_v17, %v622_v11  ;;  %v6144_v17 = vrot.slane %v6053_v33, %v326_v61 }
  0xfa   : > { %v4426_v19 = vmul.bf16 3216621497, %v6104_v13  ;;  %v6115_v25 = vpack.c.bf16 %v628_v20, %v624_v14 }
  0xfb   : > { %v4427_v21 = vmul.bf16 3216621497, %v6107_v16  ;;  %v558_v22 = vpop.f32.mrb[8].mxu0  ;;  %v4428_v27 = vmul.bf16 3216621497, %v6113_v23 }
  0xfc   : > { %5474 = vpow.bf16 %v4426_v19  ;;  %v560_v24 = vpop.f32.mrb[9].mxu0  ;;  %v559_v28 = vadd.f32 %v558_v22, %v6064_v37  ;;  %v4429_v41 = vmul.bf16 3216621497, %v6115_v25  ;;  %v631_v43 = vpop.f32.mrb[8].mxu1 }
  0xfd   : > { %5476 = vpow.bf16 %v4427_v21  ;;  %v562_v26 = vpop.f32.mrb[10].mxu0  ;;  %v561_v46 = vadd.f32 %v560_v24, %v6068_v39  ;;  %v632_v48 = vadd.f32 %v631_v43, %v6072_v40  ;;  %v633_v49 = vpop.f32.mrb[9].mxu1 }
  0xfe   : > { %v563_v29 = vadd.f32 %v562_v26, %v6064_v37  ;;  %v564_v38 = vpop.f32.mrb[11].mxu0  ;;  %5478 = vpow.bf16 %v4428_v27  ;;  %v634_v54 = vadd.f32 %v633_v49, %v6077_v42  ;;  %v635_v56 = vpop.f32.mrb[10].mxu1 }
  0xff   : > { %v5467_v45 = vpop.eup %5466  ;;  %v565_v47 = vadd.f32 %v564_v38, %v6068_v39  ;;  %5480 = vpow.bf16 %v4429_v41  ;;  %v636_v59 = vadd.f32 %v635_v56, %v6072_v40  ;;  %v637_v60 = vpop.f32.mrb[11].mxu1 }
 0x100   : > { %v5469_v50 = vpop.eup %5468  ;;  %v1154_v51 = vadd.bf16 1065369472, %v5467_v45  ;;  %v6125_v53 = vpack.c.bf16 %v563_v29, %v559_v28  ;;  %v638_v3 = vadd.f32 %v637_v60, %v6077_v42 }
 0x101   : > { %v1155_v57 = vadd.bf16 1065369472, %v5469_v50  ;;  %v6128_v58 = vpack.c.bf16 %v565_v47, %v561_v46  ;;  %v5471_v63 = vpop.eup %5470  ;;  %v6135_v8 = vpack.c.bf16 %v636_v59, %v632_v48 }
 0x102   : > { %5482 = vrcp.bf16 %v1154_v51  ;;  %v4437_v1 = vmul.bf16 3216621497, %v6125_v53  ;;  %v5473_v4 = vpop.eup %5472  ;;  %v1156_v7 = vadd.bf16 1065369472, %v5471_v63  ;;  %v6137_v11 = vpack.c.bf16 %v638_v3, %v634_v54 }
 0x103   : > { %5484 = vrcp.bf16 %v1155_v57  ;;  %v4438_v5 = vmul.bf16 3216621497, %v6128_v58  ;;  %v568_v6 = vpop.f32.mrb[12].mxu0  ;;  %v1157_v10 = vadd.bf16 1065369472, %v5473_v4 }
 0x104   : > { %5486 = vpow.bf16 %v4437_v1  ;;  %v570_v9 = vpop.f32.mrb[13].mxu0  ;;  %v4439_v14 = vmul.bf16 3216621497, %v6135_v8  ;;  %v569_v18 = vadd.f32 %v568_v6, %v6064_v37  ;;  %v4440_v21 = vmul.bf16 3216621497, %v6137_v11  ;;  %v641_v22 = vpop.f32.mrb[12].mxu1 }
 0x105   : > { %5488 = vpow.bf16 %v4438_v5  ;;  %v572_v12 = vpop.f32.mrb[14].mxu0  ;;  %v571_v26 = vadd.f32 %v570_v9, %v6068_v39  ;;  %v642_v28 = vadd.f32 %v641_v22, %v6072_v40  ;;  %v643_v29 = vpop.f32.mrb[13].mxu1 }
 0x106   : > { %5490 = vrcp.bf16 %v1156_v7  ;;  %v573_v19 = vadd.f32 %v572_v12, %v6064_v37  ;;  %v574_v20 = vpop.f32.mrb[15].mxu0  ;;  %v644_v37 = vadd.f32 %v643_v29, %v6077_v42  ;;  %v645_v44 = vpop.f32.mrb[14].mxu1 }
 0x107   : > { %v5475_v24 = vpop.eup %5474  ;;  %5492 = vrcp.bf16 %v1157_v10  ;;  %v575_v27 = vadd.f32 %v574_v20, %v6068_v39  ;;  %v646_v47 = vadd.f32 %v645_v44, %v6072_v40  ;;  %v647_v48 = vpop.f32.mrb[15].mxu1 }
 0x108   : > { %v5477_v38 = vpop.eup %5476  ;;  %v1165_v41 = vadd.bf16 1065369472, %v5475_v24  ;;  %v6152_v43 = vpack.c.bf16 %v573_v19, %v569_v18  ;;  %5494 = vpow.bf16 %v4439_v14  ;;  %v648_v50 = vadd.f32 %v647_v48, %v6077_v42 }
 0x109   : > { %v1166_v45 = vadd.bf16 1065369472, %v5477_v38  ;;  %v6155_v46 = vpack.c.bf16 %v575_v27, %v571_v26  ;;  %5496 = vpow.bf16 %v4440_v21  ;;  %v5479_v49 = vpop.eup %5478  ;;  %v6161_v57 = vpack.c.bf16 %v646_v47, %v642_v28 }
 0x10a   : > { %5498 = vrcp.bf16 %v1165_v41  ;;  %v4448_v39 = vmul.bf16 3216621497, %v6152_v43  ;;  %v5481_v51 = vpop.eup %5480  ;;  %v1167_v56 = vadd.bf16 1065369472, %v5479_v49  ;;  %v6163_v61 = vpack.c.bf16 %v648_v50, %v644_v37 }
 0x10b   : > { %5500 = vrcp.bf16 %v1166_v45  ;;  %v4449_v54 = vmul.bf16 3216621497, %v6155_v46  ;;  %v684_v59 = vpop.f32.mrb[16].mxu0  ;;  %v1168_v60 = vadd.bf16 1065369472, %v5481_v51 }
 0x10c   : > { %5502 = vpow.bf16 %v4448_v39  ;;  %v685_v40 = vadd.f32 %v684_v59, %v6141_v15  ;;  %v686_v63 = vpop.f32.mrb[17].mxu0  ;;  %v4450_v3 = vmul.bf16 3216621497, %v6161_v57  ;;  %v4451_v7 = vmul.bf16 3216621497, %v6163_v61 }
 0x10d   : > { %v5483_v1 = vpop.eup %5482  ;;  %5504 = vpow.bf16 %v4449_v54  ;;  %v687_v42 = vadd.f32 %v686_v63, %v6144_v17  ;;  %v688_v4 = vpop.f32.mrb[18].mxu0 }
 0x10e   : > { %v5485_v5 = vpop.eup %5484  ;;  %v1199_v6 = vmul.bf16 1065369472, %v5483_v1  ;;  %5506 = vrcp.bf16 %v1167_v56  ;;  %v689_v9 = vadd.f32 %v688_v4, %v6141_v15  ;;  %v690_v10 = vpop.f32.mrb[19].mxu0 }
 0x10f   : > { %v6170_v12 = vpop.f32.mrb[16].mxu1  ;;  %v5487_v14 = vpop.eup %5486  ;;  %v1201_v18 = vmul.bf16 1065369472, %v5485_v5  ;;  %5508 = vrcp.bf16 %v1168_v60  ;;  %v691_v19 = vadd.f32 %v690_v10, %v6144_v17 }
 0x110   : > { %v6173_v20 = vpop.f32.mrb[17].mxu1  ;;  %v5489_v21 = vpop.eup %5488  ;;  %v1286_v22 = vmul.bf16 %v1199_v6, %v6084_v52  ;;  %v1176_v24 = vadd.bf16 1065369472, %v5487_v14  ;;  %5510 = vpow.bf16 %v4450_v3  ;;  %v6176_v26 = vpack.c.bf16 %v689_v9, %v685_v40 }
 0x111   : > { %v6178_v27 = vpop.f32.mrb[18].mxu1  ;;  %v5491_v28 = vpop.eup %5490  ;;  %v1287_v29 = vmul.bf16 %v1201_v18, %v6087_v55  ;;  %v1177_v38 = vadd.bf16 1065369472, %v5489_v21  ;;  %5512 = vpow.bf16 %v4451_v7  ;;  %v6181_v41 = vpack.c.bf16 %v691_v19, %v687_v42 }
 0x112   : > { %v6183_v37 = vpop.f32.mrb[19].mxu1  ;;  %v5493_v44 = vpop.eup %5492  ;;  %v1330_v45 = vunpack.c.l.bf16 %v1286_v22  ;;  %v1341_v47 = vunpack.c.h.bf16 %v1286_v22  ;;  %5514 = vrcp.bf16 %v1176_v24  ;;  %v1203_v52 = vmul.bf16 1065369472, %v5491_v28 }
 0x113   : > { %v5495_v48 = vpop.eup %5494  ;;  %v1331_v49 = vunpack.c.l.bf16 %v1287_v29  ;;  %v1342_v39 = vunpack.c.h.bf16 %v1287_v29  ;;  %5516 = vrcp.bf16 %v1177_v38  ;;  %v1205_v50 = vmul.bf16 1065369472, %v5493_v44  ;;  %v694_v51 = vpop.f32.mrb[20].mxu0 }
 0x114   : > { %v5497_v54 = vpop.eup %5496  ;;  %v1429_v56 = vadd.f32 %v1341_v47, %v1330_v45  ;;  %v1288_v55 = vmul.bf16 %v1203_v52, %v6093_v62  ;;  %v1178_v59 = vadd.bf16 1065369472, %v5495_v48  ;;  %v4419_v60 = vmul.bf16 3216621497, %v6176_v26  ;;  %v696_v40 = vpop.f32.mrb[21].mxu0 }
 0x115   : > { %v5499_v63 = vpop.eup %5498  ;;  %v1436_v1 = vadd.f32 %v1342_v39, %v1331_v49  ;;  %v1289_v3 = vmul.bf16 %v1205_v50, %v6095_v0  ;;  %v1179_v42 = vadd.bf16 1065369472, %v5497_v54  ;;  %v4420_v4 = vmul.bf16 3216621497, %v6181_v41  ;;  %v6189_v5 = vpop.f32.mrb[22].mxu0 }
 0x116   : > { %v5501_v6 = vpop.eup %5500  ;;  %v1221_v7 = vmul.bf16 1065369472, %v5499_v63  ;;  %v1332_v9 = vunpack.c.l.bf16 %v1288_v55  ;;  %v1343_v10 = vunpack.c.h.bf16 %v1288_v55  ;;  %5518 = vrcp.bf16 %v1178_v59  ;;  %v6191_v14 = vpop.f32.mrb[23].mxu0 }
 0x117   : > { %v6193_v62 = vpop.f32.mrb[20].mxu1  ;;  %v5503_v18 = vpop.eup %5502  ;;  %v1223_v19 = vmul.bf16 1065369472, %v5501_v6  ;;  %v1333_v21 = vunpack.c.l.bf16 %v1289_v3  ;;  %v1344_v22 = vunpack.c.h.bf16 %v1289_v3  ;;  %5520 = vrcp.bf16 %v1179_v42 }
 0x118   : > { %v6195_v0 = vpop.f32.mrb[21].mxu1  ;;  %v5505_v24 = vpop.eup %5504  ;;  %v1297_v28 = vmul.bf16 %v1221_v7, %v6104_v13  ;;  %v1443_v29 = vadd.f32 %v1343_v10, %v1332_v9  ;;  %v1187_v38 = vadd.bf16 1065369472, %v5503_v18  ;;  %5522 = vpow.bf16 %v4419_v60 }
 0x119   : > { %v6198_v44 = vpop.f32.mrb[22].mxu1  ;;  %v5507_v45 = vpop.eup %5506  ;;  %v1298_v47 = vmul.bf16 %v1223_v19, %v6107_v16  ;;  %v1450_v52 = vadd.f32 %v1344_v22, %v1333_v21  ;;  %v1188_v48 = vadd.bf16 1065369472, %v5505_v24  ;;  %5524 = vpow.bf16 %v4420_v4 }
 0x11a   : > { %v6201_v49 = vpop.f32.mrb[23].mxu1  ;;  %v5509_v39 = vpop.eup %5508  ;;  %v1352_v50 = vunpack.c.l.bf16 %v1297_v28  ;;  %v1363_v54 = vunpack.c.h.bf16 %v1297_v28  ;;  %5526 = vrcp.bf16 %v1187_v38  ;;  %v1225_v55 = vmul.bf16 1065369472, %v5507_v45 }
 0x11b   : > { %v5511_v59 = vpop.eup %5510  ;;  %v1353_v13 = vunpack.c.l.bf16 %v1298_v47  ;;  %v1364_v63 = vunpack.c.h.bf16 %v1298_v47  ;;  %5528 = vrcp.bf16 %v1188_v48  ;;  %v1227_v60 = vmul.bf16 1065369472, %v5509_v39  ;;  %v6203_v3 = vpop.f32.mrb[24].mxu0 }
 0x11c   : > { %v5513_v42 = vpop.eup %5512  ;;  %v1430_v6 = vadd.f32 %v1429_v56, %v1352_v50  ;;  %v1299_v16 = vmul.bf16 %v1225_v55, %v6113_v23  ;;  %v1189_v7 = vadd.bf16 1065369472, %v5511_v59  ;;  %v695_v4 = vadd.f32 %v694_v51, %v6141_v15  ;;  %v6207_v9 = vpop.f32.mrb[25].mxu0 }
 0x11d   : > { %v5515_v10 = vpop.eup %5514  ;;  %v1437_v18 = vadd.f32 %v1436_v1, %v1353_v13  ;;  %v1300_v19 = vmul.bf16 %v1227_v60, %v6115_v25  ;;  %v1190_v21 = vadd.bf16 1065369472, %v5513_v42  ;;  %v697_v22 = vadd.f32 %v696_v40, %v6144_v17  ;;  %v6211_v24 = vpop.f32.mrb[26].mxu0 }
 0x11e   : > { %v5517_v28 = vpop.eup %5516  ;;  %v1431_v38 = vadd.f32 %v1430_v6, %v1363_v54  ;;  %v1243_v45 = vmul.bf16 1065369472, %v5515_v10  ;;  %v1354_v56 = vunpack.c.l.bf16 %v1299_v16  ;;  %v1365_v47 = vunpack.c.h.bf16 %v1299_v16  ;;  %v6213_v23 = vpop.f32.mrb[27].mxu0 }
 0x11f   : > { %v6215_v48 = vpop.f32.mrb[24].mxu1  ;;  %v1438_v51 = vadd.f32 %v1437_v18, %v1364_v63  ;;  %v1245_v39 = vmul.bf16 1065369472, %v5517_v28  ;;  %v1355_v50 = vunpack.c.l.bf16 %v1300_v19  ;;  %v1366_v1 = vunpack.c.h.bf16 %v1300_v19 }
 0x120   : > { %v6217_v55 = vpop.f32.mrb[25].mxu1  ;;  %v1308_v25 = vmul.bf16 %v1243_v45, %v6125_v53  ;;  %v1444_v40 = vadd.f32 %v1443_v29, %v1354_v56  ;;  %5530 = vrcp.bf16 %v1189_v7  ;;  %v699_v54 = vadd.f32 %v6189_v5, %v6141_v15 }
 0x121   : > { %v6222_v59 = vpop.f32.mrb[26].mxu1  ;;  %v5519_v13 = vpop.eup %5518  ;;  %v1309_v60 = vmul.bf16 %v1245_v39, %v6128_v58  ;;  %v1451_v42 = vadd.f32 %v1450_v52, %v1355_v50  ;;  %5532 = vrcp.bf16 %v1190_v21  ;;  %v701_v63 = vadd.f32 %v6191_v14, %v6144_v17 }
 0x122   : > { %v6227_v6 = vpop.f32.mrb[27].mxu1  ;;  %v5521_v16 = vpop.eup %5520  ;;  %v1374_v10 = vunpack.c.l.bf16 %v1308_v25  ;;  %v1385_v53 = vunpack.c.h.bf16 %v1308_v25  ;;  %v1445_v29 = vadd.f32 %v1444_v40, %v1365_v47  ;;  %v1247_v7 = vmul.bf16 1065369472, %v5519_v13 }
 0x123   : > { %v5523_v18 = vpop.eup %5522  ;;  %v1375_v19 = vunpack.c.l.bf16 %v1309_v60  ;;  %v1386_v5 = vunpack.c.h.bf16 %v1309_v60  ;;  %v1452_v28 = vadd.f32 %v1451_v42, %v1366_v1  ;;  %v1249_v45 = vmul.bf16 1065369472, %v5521_v16  ;;  %v714_v56 = vpop.f32.mrb[28].mxu0 }
 0x124   : > { %v5525_v30 = vpop.eup %5524  ;;  %v1432_v58 = vadd.f32 %v1431_v38, %v1374_v10  ;;  %v1310_v52 = vmul.bf16 %v1247_v7, %v6135_v8  ;;  %v1158_v21 = vadd.bf16 1065369472, %v5523_v18  ;;  %v6230_v39 = vpack.c.bf16 %v699_v54, %v695_v4  ;;  %v6232_v14 = vpop.f32.mrb[29].mxu0 }
 0x125   : > { %v5527_v50 = vpop.eup %5526  ;;  %v1439_v36 = vadd.f32 %v1438_v51, %v1375_v19  ;;  %v1311_v47 = vmul.bf16 %v1249_v45, %v6137_v11  ;;  %v1159_v25 = vadd.bf16 1065369472, %v5525_v30  ;;  %v6235_v40 = vpack.c.bf16 %v701_v63, %v697_v22  ;;  %v718_v13 = vpop.f32.mrb[30].mxu0 }
 0x126   : > { %v5529_v1 = vpop.eup %5528  ;;  %v1433_v60 = vadd.f32 %v1432_v58, %v1385_v53  ;;  %v1265_v42 = vmul.bf16 1065369472, %v5527_v50  ;;  %v1376_v16 = vunpack.c.l.bf16 %v1310_v52  ;;  %v1387_v38 = vunpack.c.h.bf16 %v1310_v52  ;;  %v6237_v10 = vpop.f32.mrb[31].mxu0 }
 0x127   : > { %v6239_v8 = vpop.f32.mrb[28].mxu1  ;;  %v1440_v4 = vadd.f32 %v1439_v36, %v1386_v5  ;;  %v1267_v54 = vmul.bf16 1065369472, %v5529_v1  ;;  %v1377_v7 = vunpack.c.l.bf16 %v1311_v47  ;;  %v1388_v18 = vunpack.c.h.bf16 %v1311_v47 }
 0x128   : > { %v6241_v51 = vpop.f32.mrb[29].mxu1  ;;  %v1319_v30 = vmul.bf16 %v1265_v42, %v6152_v43  ;;  %v1446_v11 = vadd.f32 %v1445_v29, %v1376_v16  ;;  %5534 = vrcp.bf16 %v1158_v21  ;;  %v4430_v22 = vmul.bf16 3216621497, %v6230_v39 }
 0x129   : > { %v6245_v63 = vpop.f32.mrb[30].mxu1  ;;  %v1320_v53 = vmul.bf16 %v1267_v54, %v6155_v46  ;;  %v1453_v19 = vadd.f32 %v1452_v28, %v1377_v7  ;;  %5536 = vrcp.bf16 %v1159_v25  ;;  %v4431_v45 = vmul.bf16 3216621497, %v6235_v40 }
 0x12a   : > { %v6249_v36 = vpop.f32.mrb[31].mxu1  ;;  %v1396_v5 = vunpack.c.l.bf16 %v1319_v30  ;;  %v1407_v58 = vunpack.c.h.bf16 %v1319_v30  ;;  %v1447_v52 = vadd.f32 %v1446_v11, %v1387_v38  ;;  %5538 = vpow.bf16 %v4430_v22 }
 0x12b   : > { %v5531_v50 = vpop.eup %5530  ;;  %v1397_v43 = vunpack.c.l.bf16 %v1320_v53  ;;  %v1408_v29 = vunpack.c.h.bf16 %v1320_v53  ;;  %v1454_v21 = vadd.f32 %v1453_v19, %v1388_v18  ;;  %5540 = vpow.bf16 %v4431_v45  ;;  %v6251_v47 = vpop.f32.mrb[32].mxu0 }
 0x12c   : > { %v5533_v1 = vpop.eup %5532  ;;  %v1434_v42 = vadd.f32 %v1433_v60, %v1396_v5  ;;  %v1269_v46 = vmul.bf16 1065369472, %v5531_v50  ;;  %v705_v28 = vadd.f32 %v6203_v3, %v6141_v15  ;;  %v707_v25 = vadd.f32 %v6207_v9, %v6144_v17  ;;  %v6257_v16 = vpop.f32.mrb[33].mxu0 }
 0x12d   : > { %v1441_v38 = vadd.f32 %v1440_v4, %v1397_v43  ;;  %v1271_v54 = vmul.bf16 1065369472, %v5533_v1  ;;  %v709_v7 = vadd.f32 %v6211_v24, %v6141_v15  ;;  %v711_v18 = vadd.f32 %v6213_v23, %v6144_v17  ;;  %v6263_v30 = vpop.f32.mrb[34].mxu0  ;;  %v6268_v9 = vpop.f32.mrb[32].mxu1 }
 0x12e   : > { %v1435_v60 = vadd.f32 %v1434_v42, %v1407_v58  ;;  %v1321_v11 = vmul.bf16 %v1269_v46, %v6161_v57  ;;  %v715_v3 = vadd.f32 %v714_v56, %v6141_v15  ;;  %v330_v22 = vsub.s32 6, %v6045_v31  ;;  %v6275_v45 = vpop.f32.mrb[33].mxu1  ;;  %v6277_v23 = vpop.f32.mrb[35].mxu0 }
 0x12f   : > { %v1442_v53 = vadd.f32 %v1441_v38, %v1408_v29  ;;  %v1322_v4 = vmul.bf16 %v1271_v54, %v6163_v61  ;;  %v6271_v19 = vpack.c.bf16 %v709_v7, %v705_v28  ;;  %v6273_v24 = vpack.c.bf16 %v711_v18, %v707_v25  ;;  %7483 = vst [vmem:[#allocation4_spill] sm:$0xff] %v6277_v23  ;;  %v6280_v50 = vpop.f32.mrb[34].mxu1 }
 0x130   : > { %v1542_v5 = vrot.slane %v1435_v60, 4  ;;  %v1398_v58 = vunpack.c.l.bf16 %v1321_v11  ;;  %v1409_v57 = vunpack.c.h.bf16 %v1321_v11  ;;  %v719_v56 = vadd.f32 %v718_v13, %v6141_v15  ;;  %v6283_v42 = vpop.f32.mrb[35].mxu1 }
 0x131   : > { %v1548_v43 = vrot.slane %v1442_v53, 4  ;;  %v1399_v1 = vunpack.c.l.bf16 %v1322_v4  ;;  %v1410_v29 = vunpack.c.h.bf16 %v1322_v4  ;;  %v4441_v61 = vmul.bf16 3216621497, %v6271_v19 }
 0x132   : > { %v1543_v46 = vadd.f32 %v1542_v5, %v1435_v60  ;;  %v1448_v28 = vadd.f32 %v1447_v52, %v1398_v58  ;;  %v4442_v25 = vmul.bf16 3216621497, %v6273_v24  ;;  %v6286_v38 = vpack.c.bf16 %v719_v56, %v715_v3 }
 0x133   : > { %v5535_v54 = vpop.eup %5534  ;;  %v1455_v7 = vadd.f32 %v1454_v21, %v1399_v1  ;;  %v1549_v18 = vadd.f32 %v1548_v43, %v1442_v53  ;;  %5542 = vpow.bf16 %v4441_v61  ;;  %v334_v15 = vsub.s32 7, %v6045_v31  ;;  %v6289_v13 = vpop.f32.mrb[36].mxu0 }
 0x134   : > { %v5537_v11 = vpop.eup %5536  ;;  %v1544_v4 = vrot.slane %v1543_v46, 2  ;;  %v6291_v2 = vadd.f32 %v1448_v28, %v1409_v57  ;;  %v1207_v23 = vmul.bf16 1065369472, %v5535_v54  ;;  %5544 = vpow.bf16 %v4442_v25  ;;  %v6293_v60 = vpop.f32.mrb[37].mxu0 }
 0x135   : > { %7484 = vst [vmem:[#allocation5_spill] sm:$0xff] %v6293_v60  ;;  %v5539_v52 = vpop.eup %5538  ;;  %v1456_v5 = vadd.f32 %v1455_v7, %v1410_v29  ;;  %v1550_v3 = vrot.slane %v1549_v18, 2  ;;  %v717_v21 = vadd.f32 %v6232_v14, %v6144_v17  ;;  %v6298_v53 = vrot.slane %v6053_v33, %v330_v22  ;;  %v6300_v58 = vpop.f32.mrb[38].mxu0 }
 0x136   : > { %v5541_v56 = vpop.eup %5540  ;;  %v1545_v43 = vadd.f32 %v1544_v4, %v1543_v46  ;;  %v1209_v1 = vmul.bf16 1065369472, %v5537_v11  ;;  %v1169_v57 = vadd.bf16 1065369472, %v5539_v52  ;;  %v721_v61 = vadd.f32 %v6237_v10, %v6144_v17  ;;  %v6304_v28 = vpop.f32.mrb[36].mxu1 }
 0x137   : > { %v6306_v25 = vpop.f32.mrb[39].mxu0  ;;  %v1560_v29 = vrot.slane %v1456_v5, 4  ;;  %v1551_v54 = vadd.f32 %v1550_v3, %v1549_v18  ;;  %v1170_v7 = vadd.bf16 1065369472, %v5541_v56  ;;  %v4452_v14 = vmul.bf16 3216621497, %v6286_v38 }
 0x138   : > { %v6309_v22 = vpop.f32.mrb[37].mxu1  ;;  %v1546_v31 = vrot.slane %v1545_v43, 1  ;;  %v1290_v60 = vmul.bf16 %v1207_v23, %v6176_v26  ;;  %v6313_v46 = vrot.slane %v6053_v33, %v334_v15  ;;  %5546 = vrcp.bf16 %v1169_v57 }
 0x139   : > { %v6315_v11 = vpop.f32.mrb[38].mxu1  ;;  %v1552_v17 = vrot.slane %v1551_v54, 1  ;;  %v6320_v18 = vmul.bf16 %v1209_v1, %v6181_v41  ;;  %5548 = vrcp.bf16 %v1170_v7  ;;  %v1561_v52 = vadd.f32 %v1560_v29, %v1456_v5  ;;  %v5034_v29 = vld [vmem:[%s7473_s3 + $0x200] ss:$16 sps:$4 sm:$0xff]  }
 0x13a   : > { %v6317_v10 = vpop.f32.mrb[39].mxu1  ;;  %v1547_v4 = vadd.f32 %v1546_v31, %v1545_v43  ;;  %5550 = vpow.bf16 %v4452_v14  ;;  %v6322_v56 = vpack.c.bf16 %v721_v61, %v717_v21  ;;  %v758_v33 = vadd.f32 %v6170_v12, %v6298_v53 }
 0x13b   : > { %v1553_v3 = vadd.f32 %v1552_v17, %v1551_v54  ;;  %v6326_v26 = vpop.f32.mrb[40].mxu0  ;;  %v1334_v15 = vunpack.c.l.bf16 %v1290_v60  ;;  %v1562_v57 = vrot.slane %v1561_v52, 2  ;;  %v760_v31 = vadd.f32 %v6173_v20, %v6313_v46 }
 0x13c   : > { %v1608_v23 = vmul.f32 0.015625, %v1547_v4  ;;  %v6330_v43 = vpop.f32.mrb[41].mxu0  ;;  %v4453_v5 = vmul.bf16 3216621497, %v6322_v56  ;;  %v762_v21 = vadd.f32 %v6178_v27, %v6298_v53  ;;  %v764_v1 = vadd.f32 %v6183_v37, %v6313_v46  ;;  %v5037_v37 = vld [vmem:[%s7473_s3 + $0x208] ss:$16 sps:$4 sm:$0xff]  }
 0x13d   : > { %7485 = vst [vmem:[#allocation6_spill] sm:$0xff] %v6330_v43  ;;  %v1609_v41 = vmul.f32 0.015625, %v1553_v3  ;;  %v6337_v12 = vpop.f32.mrb[42].mxu0  ;;  %v1345_v54 = vunpack.c.h.bf16 %v1290_v60  ;;  %v1335_v20 = vunpack.c.l.bf16 %v6320_v18  ;;  %v1563_v7 = vadd.f32 %v1562_v57, %v1561_v52  ;;  %v5042_v3 = vld [vmem:[%s7473_s3 + $0x224] ss:$16 sps:$4 sm:$0xff]  }
 0x13e   : > { %7486 = vst [vmem:[#allocation7_spill] sm:$0xff] %v6337_v12  ;;  %v5543_v61 = vpop.eup %5542  ;;  %v768_v14 = vadd.f32 %v6193_v62, %v6298_v53  ;;  %v6345_v17 = vpop.f32.mrb[43].mxu0  ;;  %5552 = vpow.bf16 %v4453_v5  ;;  %v6353_v60 = vpack.c.bf16 %v762_v21, %v758_v33  ;;  %v1619_v52 = vpack.c.bf16 %v1608_v23, %v1608_v23  ;;  %v5045_v62 = vld [vmem:[%s7473_s3 + $0x22c] ss:$16 sps:$4 sm:$0xff]  }
 0x13f   : > { %7487 = vst [vmem:[#allocation8_spill] sm:$0xff] %v6345_v17  ;;  %v5545_v27 = vpop.eup %5544  ;;  %v1620_v4 = vpack.c.bf16 %v1609_v41, %v1609_v41  ;;  %v1180_v12 = vadd.bf16 1065369472, %v5543_v61  ;;  %v1564_v57 = vrot.slane %v1563_v7, 1  ;;  %v6358_v41 = vpack.c.bf16 %v764_v1, %v760_v31  ;;  %v5040_v1 = vld [vmem:[%s7473_s3 + $0x220] ss:$16 sps:$4 sm:$0xff]  }
 0x140   : > { %v1181_v17 = vadd.bf16 1065369472, %v5545_v27  ;;  %v4421_v43 = vmul.bf16 3216621497, %v6353_v60  ;;  %v770_v61 = vadd.f32 %v6195_v0, %v6313_v46  ;;  %v772_v33 = vadd.f32 %v6198_v44, %v6298_v53  ;;  %v5043_v0 = vld [vmem:[%s7473_s3 + $0x228] ss:$16 sps:$4 sm:$0xff]  }
 0x141   : > { %3796 = vmatprep.mubr.bf16.mxu0 %v1620_v4  ;;  %4042 = vmatprep.mubr.bf16.mxu1 %v1620_v4  ;;  %5554 = vrcp.bf16 %v1180_v12  ;;  %v1346_v23 = vunpack.c.h.bf16 %v6320_v18  ;;  %v1565_v5 = vadd.f32 %v1564_v57, %v1563_v7  ;;  %v4422_v31 = vmul.bf16 3216621497, %v6358_v41 }
 0x142   : > { %3797 = vmatmul.mubr.bf16.vlgmr.msra.gmra.mrb[48].mxu0 %v1619_v52  ;;  %4043 = vmatmul.mubr.bf16.vlgmr.msra.gmra.mrb[40].mxu1 %v1619_v52  ;;  %5556 = vrcp.bf16 %v1181_v17  ;;  %v1457_v21 = vadd.f32 %v1345_v54, %v1334_v15  ;;  %v6373_v44 = vpack.c.bf16 %v772_v33, %v768_v14  ;;  %v774_v18 = vadd.f32 %v6201_v49, %v6313_v46  ;;  %v5048_v15 = vld [vmem:[%s7473_s3 + $0x244] ss:$16 sps:$4 sm:$0xff]  }
 0x143   : > { %3806 = vmatpush1.bf16.msra.mxu0 %v5034_v29  ;;  %4052 = vmatpush1.bf16.msra.mxu1 %v5037_v37  ;;  %5558 = vpow.bf16 %v4421_v43  ;;  %v6377_v12 = vpop.f32.mrb[44].mxu0  ;;  %v5547_v7 = vpop.eup %5546  ;;  %v5051_v29 = vld [vmem:[%s7473_s3 + $0x24c] ss:$16 sps:$4 sm:$0xff]   ;;  %v1611_v54 = vmul.f32 0.015625, %v1565_v5  ;;  %v778_v43 = vadd.f32 %v6215_v48, %v6298_v53  ;;  %v780_v49 = vadd.f32 %v6217_v55, %v6313_v46  ;;  %v5046_v48 = vld [vmem:[%s7473_s3 + $0x240] ss:$16 sps:$4 sm:$0xff]  }
 0x144   : > { %3807 = vmatprep.subr.bf16.mxu0 %v5042_v3  ;;  %4053 = vmatprep.subr.bf16.mxu1 %v5045_v62  ;;  %5560 = vpow.bf16 %v4422_v31  ;;  %v6389_v14 = vpop.f32.mrb[45].mxu0  ;;  %v5549_v17 = vpop.eup %5548  ;;  %v1229_v27 = vmul.bf16 1065369472, %v5547_v7  ;;  %v4432_v4 = vmul.bf16 3216621497, %v6373_v44  ;;  %v6392_v37 = vpack.c.bf16 %v774_v18, %v770_v61 }
 0x145   : > { %v782_v3 = vadd.f32 %v6222_v59, %v6298_v53  ;;  %v6396_v52 = vpop.f32.mrb[46].mxu0  ;;  %v5551_v62 = vpop.eup %5550  ;;  %v1464_v57 = vadd.f32 %v1346_v23, %v1335_v20  ;;  %v1231_v33 = vmul.bf16 1065369472, %v5549_v17  ;;  %v1622_v55 = vpack.c.bf16 %v1611_v54, %v1611_v54  ;;  %v5049_v59 = vld [vmem:[%s7473_s3 + $0x248] ss:$16 sps:$4 sm:$0xff]  }
 0x146   : > { %v784_v5 = vadd.f32 %v6227_v6, %v6313_v46  ;;  %v6403_v31 = vpop.f32.mrb[47].mxu0  ;;  %v1301_v61 = vmul.bf16 %v1229_v27, %v6230_v39  ;;  %v1191_v20 = vadd.bf16 1065369472, %v5551_v62  ;;  %5562 = vpow.bf16 %v4432_v4  ;;  %v5054_v6 = vld [vmem:[%s7473_s3 + $0x264] ss:$16 sps:$4 sm:$0xff]  }
 0x147   : > { %3808 = vmatpush1.bf16.msra.mxu0 %v5040_v1  ;;  %4054 = vmatpush1.bf16.msra.mxu1 %v5043_v0  ;;  %v4433_v23 = vmul.bf16 3216621497, %v6392_v37  ;;  %v1554_v18 = vrot.slane %v6291_v2, 4  ;;  %v1302_v7 = vmul.bf16 %v1231_v33, %v6235_v40  ;;  %v5057_v39 = vld [vmem:[%s7473_s3 + $0x26c] ss:$16 sps:$4 sm:$0xff]   ;;  %v6418_v1 = vpack.c.bf16 %v782_v3, %v778_v43 }
 0x148   : > { %3809 = vmatprep.subr.bf16.mxu0 %v5048_v15  ;;  %4055 = vmatprep.subr.bf16.mxu1 %v5051_v29  ;;  %v6420_v0 = vpack.c.bf16 %v784_v5, %v780_v49  ;;  %v1356_v54 = vunpack.c.l.bf16 %v1301_v61  ;;  %v1367_v17 = vunpack.c.h.bf16 %v1301_v61  ;;  %5564 = vrcp.bf16 %v1191_v20  ;;  %v5052_v4 = vld [vmem:[%s7473_s3 + $0x260] ss:$16 sps:$4 sm:$0xff]   ;;  %v6431_v49 = vld [vmem:[%s7472_s2 + $0x8] sm:$0x7] }
 0x149   : > { %3837 = vmatprep.mubr.bf16.mxu0 %v1622_v55  ;;  %4083 = vmatprep.mubr.bf16.mxu1 %v1622_v55  ;;  %v788_v40 = vadd.f32 %v6239_v8, %v6298_v53  ;;  %v5553_v15 = vpop.eup %5552  ;;  %v1357_v29 = vunpack.c.l.bf16 %v1302_v7  ;;  %v1368_v27 = vunpack.c.h.bf16 %v1302_v7  ;;  %5566 = vpow.bf16 %v4433_v23  ;;  %v5055_v8 = vld [vmem:[%s7473_s3 + $0x268] ss:$16 sps:$4 sm:$0xff]  }
 0x14a   : > { %v4443_v43 = vmul.bf16 3216621497, %v6418_v1  ;;  %v1458_v3 = vadd.f32 %v1457_v21, %v1356_v54  ;;  %v1192_v62 = vadd.bf16 1065369472, %v5553_v15  ;;  %v4444_v33 = vmul.bf16 3216621497, %v6420_v0 }
 0x14b   : > { %3810 = vmatpush1.bf16.msra.mxu0 %v5046_v48  ;;  %4056 = vmatpush1.bf16.msra.mxu1 %v5049_v59  ;;  %v790_v55 = vadd.f32 %v6241_v51, %v6313_v46  ;;  %v1465_v61 = vadd.f32 %v1464_v57, %v1357_v29  ;;  %v5060_v21 = vld [vmem:[%s7473_s3 + $0x284] ss:$16 sps:$4 sm:$0xff]   ;;  %v5063_v48 = vld [vmem:[%s7473_s3 + $0x28c] ss:$16 sps:$4 sm:$0xff]   ;;  %v792_v59 = vadd.f32 %v6245_v63, %v6298_v53  ;;  %v5058_v15 = vld [vmem:[%s7473_s3 + $0x280] ss:$16 sps:$4 sm:$0xff]  }
 0x14c   : > { %v5555_v5 = vpop.eup %5554  ;;  %3811 = vmatprep.subr.bf16.mxu0 %v5054_v6  ;;  %4057 = vmatprep.subr.bf16.mxu1 %v5057_v39  ;;  %5568 = vpow.bf16 %v4443_v43  ;;  %v794_v20 = vadd.f32 %v6249_v36, %v6313_v46  ;;  %v1459_v23 = vadd.f32 %v1458_v3, %v1367_v17  ;;  %v6451_v7 = vrot.slane %v6431_v49, %v6059_v35  ;;  %v5061_v46 = vld [vmem:[%s7473_s3 + $0x288] ss:$16 sps:$4 sm:$0xff]   ;;  %v5066_v17 = vld [vmem:[%s7473_s3 + $0x2a4] ss:$16 sps:$4 sm:$0xff]  }
 0x14d   : > { %v5557_v51 = vpop.eup %5556  ;;  %v1251_v57 = vmul.bf16 1065369472, %v5555_v5  ;;  %5570 = vrcp.bf16 %v1192_v62  ;;  %v1466_v39 = vadd.f32 %v1465_v61, %v1368_v27  ;;  %v6456_v63 = vpack.c.bf16 %v792_v59, %v788_v40 }
 0x14e   : > { %v5559_v6 = vpop.eup %5558  ;;  %v1253_v54 = vmul.bf16 1065369472, %v5557_v51  ;;  %5572 = vpow.bf16 %v4444_v33  ;;  %v6465_v27 = vpack.c.bf16 %v794_v20, %v790_v55  ;;  %v912_v40 = vadd.f32 %v6268_v9, %v6451_v7 }
 0x14f   : > { %v5561_v53 = vpop.eup %5560  ;;  %v1312_v36 = vmul.bf16 %v1251_v57, %v6271_v19  ;;  %3812 = vmatpush1.bf16.msra.mxu0 %v5052_v4  ;;  %4058 = vmatpush1.bf16.msra.mxu1 %v5055_v8  ;;  %v1160_v29 = vadd.bf16 1065369472, %v5559_v6  ;;  %v5069_v19 = vld [vmem:[%s7473_s3 + $0x2ac] ss:$16 sps:$4 sm:$0xff]   ;;  %v4454_v3 = vmul.bf16 3216621497, %v6456_v63  ;;  %v904_v8 = vadd.f32 %v6275_v45, %v6451_v7 }
 0x150   : > { %v1313_v43 = vmul.bf16 %v1253_v54, %v6273_v24  ;;  %3813 = vmatprep.subr.bf16.mxu0 %v5060_v21  ;;  %4059 = vmatprep.subr.bf16.mxu1 %v5063_v48  ;;  %v1161_v4 = vadd.bf16 1065369472, %v5561_v53  ;;  %v4455_v55 = vmul.bf16 3216621497, %v6465_v27  ;;  %v6479_v61 = vrot.slane %v6431_v49, %v6048_v32  ;;  %v5064_v45 = vld [vmem:[%s7473_s3 + $0x2a0] ss:$16 sps:$4 sm:$0xff]  }
 0x151   : > { %v1378_v62 = vunpack.c.l.bf16 %v1312_v36  ;;  %v1389_v33 = vunpack.c.h.bf16 %v1312_v36  ;;  %5574 = vrcp.bf16 %v1160_v29  ;;  %v5563_v9 = vpop.eup %5562  ;;  %v5067_v48 = vld [vmem:[%s7473_s3 + $0x2a8] ss:$16 sps:$4 sm:$0xff]   ;;  %v915_v20 = vadd.f32 %v6280_v50, %v6451_v7  ;;  %v5075_v6 = vld [vmem:[%s7473_s3 + $0x2cc] ss:$16 sps:$4 sm:$0xff]  }
 0x152   : > { %v1379_v5 = vunpack.c.l.bf16 %v1313_v43  ;;  %v1390_v24 = vunpack.c.h.bf16 %v1313_v43  ;;  %5576 = vrcp.bf16 %v1161_v4  ;;  %v1171_v59 = vadd.bf16 1065369472, %v5563_v9 }
 0x153   : > { %v1460_v21 = vadd.f32 %v1459_v23, %v1378_v62  ;;  %3814 = vmatpush1.bf16.msra.mxu0 %v5058_v15  ;;  %4060 = vmatpush1.bf16.msra.mxu1 %v5061_v46  ;;  %5578 = vpow.bf16 %v4454_v3  ;;  %v5565_v51 = vpop.eup %5564  ;;  %v5072_v23 = vld [vmem:[%s7473_s3 + $0x2c4] ss:$16 sps:$4 sm:$0xff]   ;;  %v831_v54 = vadd.f32 %v6251_v47, %v6479_v61  ;;  %v6499_v15 = vrot.slane %v6431_v49, %v6056_v34  ;;  %v5070_v49 = vld [vmem:[%s7473_s3 + $0x2c0] ss:$16 sps:$4 sm:$0xff]  }
 0x154   : > { %v1467_v57 = vadd.f32 %v1466_v39, %v1379_v5  ;;  %3815 = vmatprep.subr.bf16.mxu0 %v5066_v17  ;;  %4061 = vmatprep.subr.bf16.mxu1 %v5069_v19  ;;  %5580 = vpow.bf16 %v4455_v55  ;;  %v5567_v50 = vpop.eup %5566  ;;  %v1273_v53 = vmul.bf16 1065369472, %v5565_v51  ;;  %v6501_v36 = vpack.c.bf16 %v915_v20, %v912_v40  ;;  %v5073_v40 = vld [vmem:[%s7473_s3 + $0x2c8] ss:$16 sps:$4 sm:$0xff]   ;;  %v5081_v55 = vld [vmem:[%s7473_s3 + $0x2ec] ss:$16 sps:$4 sm:$0xff]  }
 0x155   : > { %v1461_v39 = vadd.f32 %v1460_v21, %v1389_v33  ;;  %5582 = vrcp.bf16 %v1171_v59  ;;  %v1172_v17 = vadd.bf16 1065369472, %v5567_v50  ;;  %v833_v29 = vadd.f32 %v6257_v16, %v6499_v15  ;;  %v5078_v33 = vld [vmem:[%s7473_s3 + $0x2e4] ss:$16 sps:$4 sm:$0xff]   ;;  %v5079_v51 = vld [vmem:[%s7473_s3 + $0x2e8] ss:$16 sps:$4 sm:$0xff]  }
 0x156   : > { %v1468_v46 = vadd.f32 %v1467_v57, %v1390_v24  ;;  %v907_v43 = vadd.f32 %v6283_v42, %v6451_v7  ;;  %v1323_v47 = vmul.bf16 %v1273_v53, %v6286_v38  ;;  %v4436_v4 = vmul.bf16 3216621497, %v6501_v36  ;;  %v7488_v42 = vld [vmem:[#allocation4_spill] sm:$0xff]  ;;  %v5084_v57 = vld [vmem:[%s7473_s3 + $0x304] ss:$16 sps:$4 sm:$0xff]  }
 0x157   : > { %v5569_v19 = vpop.eup %5568  ;;  %3816 = vmatpush1.bf16.msra.mxu0 %v5064_v45  ;;  %4062 = vmatpush1.bf16.msra.mxu1 %v5067_v48  ;;  %v835_v16 = vadd.f32 %v6263_v30, %v6479_v61  ;;  %v837_v3 = vadd.f32 %v7488_v42, %v6499_v15  ;;  %v6522_v38 = vadd.f32 %v1554_v18, %v6291_v2  ;;  %5584 = vrcp.bf16 %v1172_v17 }
 0x158   : > { %v5571_v62 = vpop.eup %5570  ;;  %3817 = vmatprep.subr.bf16.mxu0 %v5072_v23  ;;  %4063 = vmatprep.subr.bf16.mxu1 %v5075_v6  ;;  %v1182_v30 = vadd.bf16 1065369472, %v5569_v19  ;;  %v6530_v9 = vpack.c.bf16 %v907_v43, %v904_v8  ;;  %v1400_v24 = vunpack.c.l.bf16 %v1323_v47  ;;  %v1411_v21 = vunpack.c.h.bf16 %v1323_v47  ;;  %v5076_v8 = vld [vmem:[%s7473_s3 + $0x2e0] ss:$16 sps:$4 sm:$0xff]  }
 0x159   : > { %v5573_v5 = vpop.eup %5572  ;;  %v1275_v45 = vmul.bf16 1065369472, %v5571_v62  ;;  %5586 = vpow.bf16 %v4436_v4  ;;  %v6533_v48 = vpack.c.bf16 %v835_v16, %v831_v54  ;;  %v6545_v23 = vpack.c.bf16 %v837_v3, %v833_v29  ;;  %v5085_v3 = vld [vmem:[%s7473_s3 + $0x308] ss:$16 sps:$4 sm:$0xff]  }
 0x15a   : > { %5588 = vrcp.bf16 %v1182_v30  ;;  %v1183_v2 = vadd.bf16 1065369472, %v5573_v5  ;;  %v4425_v18 = vmul.bf16 3216621497, %v6530_v9  ;;  %v1462_v59 = vadd.f32 %v1461_v39, %v1400_v24 }
 0x15b   : > { %v1324_v20 = vmul.bf16 %v1275_v45, %v6322_v56  ;;  %3818 = vmatpush1.bf16.msra.mxu0 %v5070_v49  ;;  %4064 = vmatpush1.bf16.msra.mxu1 %v5073_v40  ;;  %v5087_v56 = vld [vmem:[%s7473_s3 + $0x30c] ss:$16 sps:$4 sm:$0xff]   ;;  %v1556_v54 = vrot.slane %v6522_v38, 2  ;;  %v4423_v50 = vmul.bf16 3216621497, %v6533_v48  ;;  %v6554_v39 = vadd.f32 %v6304_v28, %v6451_v7 }
 0x15c   : > { %v5575_v6 = vpop.eup %5574  ;;  %3819 = vmatprep.subr.bf16.mxu0 %v5078_v33  ;;  %4065 = vmatprep.subr.bf16.mxu1 %v5081_v55  ;;  %5590 = vrcp.bf16 %v1183_v2  ;;  %v6556_v17 = vadd.f32 %v1462_v59, %v1411_v21  ;;  %v5082_v49 = vld [vmem:[%s7473_s3 + $0x300] ss:$16 sps:$4 sm:$0xff]   ;;  %v841_v4 = vadd.f32 %v6289_v13, %v6479_v61  ;;  %v6565_v28 = vadd.f32 %v6309_v22, %v6451_v7  ;;  %v5090_v13 = vld [vmem:[%s7473_s3 + $0x324] ss:$16 sps:$4 sm:$0xff]   ;;  %v5093_v22 = vld [vmem:[%s7473_s3 + $0x32c] ss:$16 sps:$4 sm:$0xff]  }
 0x15d   : > { %v5577_v53 = vpop.eup %5576  ;;  %v1401_v29 = vunpack.c.l.bf16 %v1324_v20  ;;  %v1412_v43 = vunpack.c.h.bf16 %v1324_v20  ;;  %v1211_v19 = vmul.bf16 1065369472, %v5575_v6  ;;  %5592 = vpow.bf16 %v4425_v18  ;;  %v7489_v2 = vld [vmem:[#allocation5_spill] sm:$0xff] }
 0x15e   : > { %v5579_v47 = vpop.eup %5578  ;;  %v1213_v40 = vmul.bf16 1065369472, %v5577_v53  ;;  %v4424_v55 = vmul.bf16 3216621497, %v6545_v23  ;;  %5594 = vpow.bf16 %v4423_v50  ;;  %v6583_v18 = vadd.f32 %v7489_v2, %v6499_v15  ;;  %v5096_v53 = vld [vmem:[%s7473_s3 + $0x344] ss:$16 sps:$4 sm:$0xff]  }
 0x15f   : > { %v5581_v16 = vpop.eup %5580  ;;  %v1469_v42 = vadd.f32 %v1468_v46, %v1401_v29  ;;  %3820 = vmatpush1.bf16.msra.mxu0 %v5076_v8  ;;  %4066 = vmatpush1.bf16.msra.mxu1 %v5079_v51  ;;  %v1292_v62 = vmul.bf16 %v1211_v19, %v6353_v60  ;;  %v1193_v33 = vadd.bf16 1065369472, %v5579_v47  ;;  %v845_v60 = vadd.f32 %v6300_v58, %v6479_v61  ;;  %v5091_v58 = vld [vmem:[%s7473_s3 + $0x328] ss:$16 sps:$4 sm:$0xff]   ;;  %v5099_v29 = vld [vmem:[%s7473_s3 + $0x34c] ss:$16 sps:$4 sm:$0xff]  }
 0x160   : > { %v5583_v30 = vpop.eup %5582  ;;  %3821 = vmatprep.subr.bf16.mxu0 %v5084_v57  ;;  %4067 = vmatprep.subr.bf16.mxu1 %v5087_v56  ;;  %v1293_v46 = vmul.bf16 %v1213_v40, %v6358_v41  ;;  %v1194_v5 = vadd.bf16 1065369472, %v5581_v16  ;;  %v5088_v41 = vld [vmem:[%s7473_s3 + $0x320] ss:$16 sps:$4 sm:$0xff]  }
 0x161   : > { %v1470_v24 = vadd.f32 %v1469_v42, %v1412_v43  ;;  %v1336_v21 = vunpack.c.l.bf16 %v1292_v62  ;;  %v1347_v45 = vunpack.c.h.bf16 %v1292_v62  ;;  %v1233_v8 = vmul.bf16 1065369472, %v5583_v30 }
 0x162   : > { %v1337_v59 = vunpack.c.l.bf16 %v1293_v46  ;;  %v1348_v20 = vunpack.c.h.bf16 %v1293_v46  ;;  %5596 = vrcp.bf16 %v1193_v33  ;;  %v5585_v51 = vpop.eup %5584  ;;  %v6591_v56 = vpack.c.bf16 %v845_v60, %v841_v4  ;;  %v5102_v46 = vld [vmem:[%s7473_s3 + $0x364] ss:$16 sps:$4 sm:$0xff]  }
 0x163   : > { %v1572_v57 = vrot.slane %v1470_v24, 4  ;;  %3822 = vmatpush1.bf16.msra.mxu0 %v5082_v49  ;;  %4068 = vmatpush1.bf16.msra.mxu1 %v5085_v3  ;;  %v1471_v6 = vadd.f32 %v1347_v45, %v1336_v21  ;;  %5598 = vrcp.bf16 %v1194_v5  ;;  %v1303_v19 = vmul.bf16 %v1233_v8, %v6373_v44  ;;  %v5094_v44 = vld [vmem:[%s7473_s3 + $0x340] ss:$16 sps:$4 sm:$0xff]   ;;  %v5105_v5 = vld [vmem:[%s7473_s3 + $0x36c] ss:$16 sps:$4 sm:$0xff]  }
 0x164   : > { %v5587_v50 = vpop.eup %5586  ;;  %3823 = vmatprep.subr.bf16.mxu0 %v5090_v13  ;;  %4069 = vmatprep.subr.bf16.mxu1 %v5093_v22  ;;  %v1478_v43 = vadd.f32 %v1348_v20, %v1337_v59  ;;  %v1235_v47 = vmul.bf16 1065369472, %v5585_v51  ;;  %5600 = vpow.bf16 %v4424_v55  ;;  %v4434_v16 = vmul.bf16 3216621497, %v6591_v56  ;;  %v5097_v55 = vld [vmem:[%s7473_s3 + $0x348] ss:$16 sps:$4 sm:$0xff]  }
 0x165   : > { %v5589_v49 = vpop.eup %5588  ;;  %v1573_v40 = vadd.f32 %v1572_v57, %v1470_v24  ;;  %v1175_v4 = vadd.bf16 1065369472, %v5587_v50  ;;  %v931_v42 = vadd.f32 %v6315_v11, %v6451_v7  ;;  %v1358_v3 = vunpack.c.l.bf16 %v1303_v19  ;;  %v5108_v50 = vld [vmem:[%s7473_s3 + $0x384] ss:$16 sps:$4 sm:$0xff]  }
 0x166   : > { %v1369_v62 = vunpack.c.h.bf16 %v1303_v19  ;;  %v1304_v33 = vmul.bf16 %v1235_v47, %v6392_v37  ;;  %v1255_v30 = vmul.bf16 1065369472, %v5589_v49  ;;  %v847_v37 = vadd.f32 %v6306_v25, %v6499_v15 }
 0x167   : > { %v5591_v13 = vpop.eup %5590  ;;  %3824 = vmatpush1.bf16.msra.mxu0 %v5088_v41  ;;  %4070 = vmatpush1.bf16.msra.mxu1 %v5091_v58  ;;  %v1574_v22 = vrot.slane %v1573_v40, 2  ;;  %5602 = vrcp.bf16 %v1175_v4  ;;  %v6611_v11 = vpack.c.bf16 %v931_v42, %v6554_v39  ;;  %v1472_v60 = vadd.f32 %v1471_v6, %v1358_v3  ;;  %v5109_v42 = vld [vmem:[%s7473_s3 + $0x388] ss:$16 sps:$4 sm:$0xff]  }
 0x168   : > { %3825 = vmatprep.subr.bf16.mxu0 %v5096_v53  ;;  %4071 = vmatprep.subr.bf16.mxu1 %v5099_v29  ;;  %v1359_v24 = vunpack.c.l.bf16 %v1304_v33  ;;  %v1370_v21 = vunpack.c.h.bf16 %v1304_v33  ;;  %v1314_v45 = vmul.bf16 %v1255_v30, %v6418_v1  ;;  %v5593_v39 = vpop.eup %5592  ;;  %v6625_v25 = vadd.f32 %v1556_v54, %v6522_v38  ;;  %v5100_v1 = vld [vmem:[%s7473_s3 + $0x360] ss:$16 sps:$4 sm:$0xff]   ;;  %v5103_v38 = vld [vmem:[%s7473_s3 + $0x368] ss:$16 sps:$4 sm:$0xff]   ;;  %v5111_v53 = vld [vmem:[%s7473_s3 + $0x38c] ss:$16 sps:$4 sm:$0xff]  }
 0x169   : > { %v1257_v2 = vmul.bf16 1065369472, %v5591_v13  ;;  %5604 = vpow.bf16 %v4434_v16  ;;  %v4458_v59 = vmul.bf16 3216621497, %v6611_v11  ;;  %v1473_v20 = vadd.f32 %v1472_v60, %v1369_v62  ;;  %v5595_v41 = vpop.eup %5594  ;;  %v5114_v30 = vld [vmem:[%s7473_s3 + $0x3a4] ss:$16 sps:$4 sm:$0xff]  }
 0x16a   : > { %v1479_v8 = vadd.f32 %v1478_v43, %v1359_v24  ;;  %v1380_v51 = vunpack.c.l.bf16 %v1314_v45  ;;  %v1391_v57 = vunpack.c.h.bf16 %v1314_v45  ;;  %v6634_v54 = vadd.f32 %v1574_v22, %v1573_v40 }
 0x16b   : > { %3826 = vmatpush1.bf16.msra.mxu0 %v5094_v44  ;;  %4072 = vmatpush1.bf16.msra.mxu1 %v5097_v55  ;;  %v1315_v58 = vmul.bf16 %v1257_v2, %v6420_v0  ;;  %v1164_v6 = vadd.bf16 1065369472, %v5593_v39  ;;  %5606 = vpow.bf16 %v4458_v59  ;;  %v1162_v19 = vadd.bf16 1065369472, %v5595_v41  ;;  %v5106_v0 = vld [vmem:[%s7473_s3 + $0x380] ss:$16 sps:$4 sm:$0xff]  }
 0x16c   : > { %3827 = vmatprep.subr.bf16.mxu0 %v5102_v46  ;;  %4073 = vmatprep.subr.bf16.mxu1 %v5105_v5  ;;  %v1480_v29 = vadd.f32 %v1479_v8, %v1370_v21  ;;  %v1474_v43 = vadd.f32 %v1473_v20, %v1380_v51  ;;  %v6644_v47 = vpack.c.bf16 %v847_v37, %v6583_v18  ;;  %v1558_v13 = vrot.slane %v6625_v25, 1  ;;  %v5117_v37 = vld [vmem:[%s7473_s3 + $0x3ac] ss:$16 sps:$4 sm:$0xff]   ;;  %v5112_v39 = vld [vmem:[%s7473_s3 + $0x3a0] ss:$16 sps:$4 sm:$0xff]  }
 0x16d   : > { %v5597_v49 = vpop.eup %5596  ;;  %v1381_v40 = vunpack.c.l.bf16 %v1315_v58  ;;  %v1392_v4 = vunpack.c.h.bf16 %v1315_v58  ;;  %5608 = vrcp.bf16 %v1164_v6  ;;  %v923_v22 = vadd.f32 %v6317_v10, %v6451_v7  ;;  %v5120_v41 = vld [vmem:[%s7473_s3 + $0x3c4] ss:$16 sps:$4 sm:$0xff]  }
 0x16e   : > { %v5599_v16 = vpop.eup %5598  ;;  %v1475_v3 = vadd.f32 %v1474_v43, %v1391_v57  ;;  %v1277_v62 = vmul.bf16 1065369472, %v5597_v49  ;;  %5610 = vrcp.bf16 %v1162_v19  ;;  %v4435_v33 = vmul.bf16 3216621497, %v6644_v47  ;;  %v7491_v58 = vld [vmem:[#allocation7_spill] sm:$0xff] }
 0x16f   : > { %v5601_v18 = vpop.eup %5600  ;;  %3828 = vmatpush1.bf16.msra.mxu0 %v5100_v1  ;;  %4074 = vmatpush1.bf16.msra.mxu1 %v5103_v38  ;;  %v1481_v44 = vadd.f32 %v1480_v29, %v1381_v40  ;;  %v1279_v55 = vmul.bf16 1065369472, %v5599_v16  ;;  %v1576_v46 = vrot.slane %v6634_v54, 1  ;;  %v6666_v45 = vpack.c.bf16 %v923_v22, %v6565_v28  ;;  %v5123_v1 = vld [vmem:[%s7473_s3 + $0x3cc] ss:$16 sps:$4 sm:$0xff]  }
 0x170   : > { %3829 = vmatprep.subr.bf16.mxu0 %v5108_v50  ;;  %4075 = vmatprep.subr.bf16.mxu1 %v5111_v53  ;;  %v1325_v5 = vmul.bf16 %v1277_v62, %v6456_v63  ;;  %v1163_v60 = vadd.bf16 1065369472, %v5601_v18  ;;  %5612 = vpow.bf16 %v4435_v33  ;;  %v851_v10 = vadd.f32 %v6326_v26, %v6479_v61  ;;  %v7490_v63 = vld [vmem:[#allocation6_spill] sm:$0xff]  ;;  %v7492_v50 = vld [vmem:[#allocation8_spill] sm:$0xff]  ;;  %v5126_v18 = vld [vmem:[%s7473_s3 + $0x3e4] ss:$16 sps:$4 sm:$0xff]  }
 0x171   : > { %v1482_v24 = vadd.f32 %v1481_v44, %v1392_v4  ;;  %v1326_v21 = vmul.bf16 %v1279_v55, %v6465_v27  ;;  %v853_v20 = vadd.f32 %v7490_v63, %v6499_v15  ;;  %v5115_v27 = vld [vmem:[%s7473_s3 + $0x3a8] ss:$16 sps:$4 sm:$0xff]   ;;  %v4447_v51 = vmul.bf16 3216621497, %v6666_v45 }
 0x172   : > { %v5603_v7 = vpop.eup %5602  ;;  %v1402_v2 = vunpack.c.l.bf16 %v1325_v5  ;;  %v1413_v59 = vunpack.c.h.bf16 %v1325_v5  ;;  %5614 = vrcp.bf16 %v1163_v60  ;;  %v855_v6 = vadd.f32 %v7491_v58, %v6479_v61 }
 0x173   : > { %3830 = vmatpush1.bf16.msra.mxu0 %v5106_v0  ;;  %4076 = vmatpush1.bf16.msra.mxu1 %v5109_v42  ;;  %v1403_v28 = vunpack.c.l.bf16 %v1326_v21  ;;  %v1414_v8 = vunpack.c.h.bf16 %v1326_v21  ;;  %v1241_v26 = vmul.bf16 1065369472, %v5603_v7  ;;  %v857_v53 = vadd.f32 %v7492_v50, %v6499_v15  ;;  %v5118_v42 = vld [vmem:[%s7473_s3 + $0x3c0] ss:$16 sps:$4 sm:$0xff]  }
 0x174   : > { %v5605_v57 = vpop.eup %5604  ;;  %3831 = vmatprep.subr.bf16.mxu0 %v5114_v30  ;;  %4077 = vmatprep.subr.bf16.mxu1 %v5117_v37  ;;  %v1476_v38 = vadd.f32 %v1475_v3, %v1402_v2  ;;  %v1559_v29 = vadd.f32 %v1558_v13, %v6625_v25  ;;  %5616 = vpow.bf16 %v4447_v51  ;;  %v1577_v0 = vadd.f32 %v1576_v46, %v6634_v54  ;;  %v5121_v25 = vld [vmem:[%s7473_s3 + $0x3c8] ss:$16 sps:$4 sm:$0xff]   ;;  %v5129_v30 = vld [vmem:[%s7473_s3 + $0x3ec] ss:$16 sps:$4 sm:$0xff]  }
 0x175   : > { %v1483_v43 = vadd.f32 %v1482_v24, %v1403_v28  ;;  %v1173_v19 = vadd.bf16 1065369472, %v5605_v57  ;;  %v6693_v4 = vpack.c.bf16 %v855_v6, %v851_v10  ;;  %v6695_v16 = vpack.c.bf16 %v857_v53, %v853_v20  ;;  %v5127_v10 = vld [vmem:[%s7473_s3 + $0x3e8] ss:$16 sps:$4 sm:$0xff]   ;;  %v5130_v28 = vld [vmem:[%s7473_s3 + $0x400] ss:$16 sps:$4 sm:$0xff]  }
 0x176   : > { %v5607_v49 = vpop.eup %5606  ;;  %v6691_v40 = vadd.f32 %v1476_v38, %v1413_v59  ;;  %v6706_v54 = vmul.bf16 %v1241_v26, %v6501_v36  ;;  %v861_v62 = vadd.f32 %v6377_v12, %v6479_v61  ;;  %v863_v36 = vadd.f32 %v6389_v14, %v6499_v15  ;;  %v5124_v14 = vld [vmem:[%s7473_s3 + $0x3e0] ss:$16 sps:$4 sm:$0xff]   ;;  %v5141_v38 = vld [vmem:[%s7473_s3 + $0x42c] ss:$16 sps:$4 sm:$0xff]  }
 0x177   : > { %3832 = vmatpush1.bf16.msra.mxu0 %v5112_v39  ;;  %4078 = vmatpush1.bf16.msra.mxu1 %v5115_v27  ;;  %v6703_v3 = vadd.f32 %v1483_v43, %v1414_v8  ;;  %5618 = vrcp.bf16 %v1173_v19  ;;  %v4445_v13 = vmul.bf16 3216621497, %v6693_v4  ;;  %v1197_v22 = vadd.bf16 1065369472, %v5607_v49  ;;  %v5136_v49 = vld [vmem:[%s7473_s3 + $0x420] ss:$16 sps:$4 sm:$0xff]  }
 0x178   : > { %v5609_v33 = vpop.eup %5608  ;;  %3833 = vmatprep.subr.bf16.mxu0 %v5120_v41  ;;  %4079 = vmatprep.subr.bf16.mxu1 %v5123_v1  ;;  %v4446_v12 = vmul.bf16 3216621497, %v6695_v16  ;;  %v865_v37 = vadd.f32 %v6396_v52, %v6479_v61  ;;  %v1610_v46 = vmul.f32 0.015625, %v1559_v29  ;;  %v1613_v5 = vmul.f32 0.015625, %v1577_v0  ;;  %v5138_v1 = vld [vmem:[%s7473_s3 + $0x424] ss:$16 sps:$4 sm:$0xff]  }
 0x179   : > { %v5611_v44 = vpop.eup %5610  ;;  %v1219_v55 = vmul.bf16 1065369472, %v5609_v33  ;;  %v867_v24 = vadd.f32 %v6403_v31, %v6499_v15  ;;  %v1362_v7 = vunpack.c.l.bf16 %v6706_v54  ;;  %5620 = vpow.bf16 %v4445_v13  ;;  %v5132_v31 = vld [vmem:[%s7473_s3 + $0x404] ss:$16 sps:$4 sm:$0xff]   ;;  %v5135_v15 = vld [vmem:[%s7473_s3 + $0x40c] ss:$16 sps:$4 sm:$0xff]  }
 0x17a   : > { %v1215_v60 = vmul.bf16 1065369472, %v5611_v44  ;;  %v6732_v61 = vpack.c.bf16 %v865_v37, %v861_v62  ;;  %5622 = vpow.bf16 %v4446_v12  ;;  %v1373_v8 = vunpack.c.h.bf16 %v6706_v54  ;;  %v5139_v0 = vld [vmem:[%s7473_s3 + $0x428] ss:$16 sps:$4 sm:$0xff]   ;;  %v5144_v54 = vld [vmem:[%s7473_s3 + $0x444] ss:$16 sps:$4 sm:$0xff]  }
 0x17b   : > { %v5613_v21 = vpop.eup %5612  ;;  %3834 = vmatpush1.bf16.msra.mxu0 %v5118_v42  ;;  %4080 = vmatpush1.bf16.msra.mxu1 %v5121_v25  ;;  %v1296_v52 = vmul.bf16 %v1219_v55, %v6530_v9  ;;  %v6741_v59 = vpack.c.bf16 %v867_v24, %v863_v36  ;;  %5624 = vrcp.bf16 %v1197_v22  ;;  %v1621_v41 = vpack.c.bf16 %v1610_v46, %v1610_v46  ;;  %v5147_v62 = vld [vmem:[%s7473_s3 + $0x44c] ss:$16 sps:$4 sm:$0xff]   ;;  %v5142_v44 = vld [vmem:[%s7473_s3 + $0x440] ss:$16 sps:$4 sm:$0xff]   ;;  %v5145_v55 = vld [vmem:[%s7473_s3 + $0x448] ss:$16 sps:$4 sm:$0xff]  }
 0x17c   : > { %3835 = vmatprep.subr.bf16.mxu0 %v5126_v18  ;;  %4081 = vmatprep.subr.bf16.mxu1 %v5129_v30  ;;  %v1294_v39 = vmul.bf16 %v1215_v60, %v6533_v48  ;;  %v1174_v2 = vadd.bf16 1065369472, %v5613_v21  ;;  %v4456_v27 = vmul.bf16 3216621497, %v6732_v61  ;;  %v5133_v48 = vld [vmem:[%s7473_s3 + $0x408] ss:$16 sps:$4 sm:$0xff]   ;;  %v1624_v58 = vpack.c.bf16 %v1613_v5, %v1613_v5 }
 0x17d   : > { %v5615_v9 = vpop.eup %5614  ;;  %v1340_v63 = vunpack.c.l.bf16 %v1296_v52  ;;  %v1351_v20 = vunpack.c.h.bf16 %v1296_v52  ;;  %v4457_v51 = vmul.bf16 3216621497, %v6741_v59  ;;  %v5153_v46 = vld [vmem:[%s7473_s3 + $0x46c] ss:$16 sps:$4 sm:$0xff]   ;;  %v5148_v52 = vld [vmem:[%s7473_s3 + $0x460] ss:$16 sps:$4 sm:$0xff]  }
 0x17e   : > { %5626 = vrcp.bf16 %v1174_v2  ;;  %v1338_v6 = vunpack.c.l.bf16 %v1294_v39  ;;  %v1217_v50 = vmul.bf16 1065369472, %v5615_v9  ;;  %v1349_v29 = vunpack.c.h.bf16 %v1294_v39  ;;  %v5156_v9 = vld [vmem:[%s7473_s3 + $0x484] ss:$16 sps:$4 sm:$0xff]  }
 0x17f   : > { %3836 = vmatpush1.bf16.msra.mxu0 %v5124_v14  ;;  %4082 = vmatpush1.bf16.msra.mxu1 %v5127_v10  ;;  %v1499_v26 = vadd.f32 %v1351_v20, %v1340_v63  ;;  %5628 = vpow.bf16 %v4456_v27  ;;  %v5617_v57 = vpop.eup %5616  ;;  %v5159_v63 = vld [vmem:[%s7473_s3 + $0x48c] ss:$16 sps:$4 sm:$0xff]  }
 0x180   : > { %3846 = vmatprep.subr.bf16.mxu0 %v5132_v31  ;;  %4092 = vmatprep.subr.bf16.mxu1 %v5135_v15  ;;  %v1186_v43 = vadd.bf16 1065369472, %v5617_v57  ;;  %5630 = vpow.bf16 %v4457_v51  ;;  %v1295_v33 = vmul.bf16 %v1217_v50, %v6545_v23  ;;  %v1485_v18 = vadd.f32 %v1349_v29, %v1338_v6  ;;  %v5151_v31 = vld [vmem:[%s7473_s3 + $0x468] ss:$16 sps:$4 sm:$0xff]   ;;  %v5154_v57 = vld [vmem:[%s7473_s3 + $0x480] ss:$16 sps:$4 sm:$0xff]  }
 0x181   : > { %v1500_v53 = vadd.f32 %v1499_v26, %v1362_v7  ;;  %v5160_v29 = vld [vmem:[%s7473_s3 + $0x4a0] ss:$16 sps:$4 sm:$0xff]  }
 0x182   : > { %v5619_v19 = vpop.eup %5618  ;;  %3838 = vmatmul.mubr.bf16.vlgmr.msra.gmra.mrb[48].mxu0 %v1621_v41  ;;  %4084 = vmatmul.mubr.bf16.vlgmr.msra.gmra.mrb[40].mxu1 %v1621_v41  ;;  %5632 = vrcp.bf16 %v1186_v43  ;;  %v1339_v5 = vunpack.c.l.bf16 %v1295_v33  ;;  %v1350_v60 = vunpack.c.h.bf16 %v1295_v33  ;;  %v5157_v41 = vld [vmem:[%s7473_s3 + $0x488] ss:$16 sps:$4 sm:$0xff]  }
 0x183   : > { %3847 = vmatpush1.bf16.msra.mxu0 %v5130_v28  ;;  %4093 = vmatpush1.bf16.msra.mxu1 %v5133_v48  ;;  %v1237_v42 = vmul.bf16 1065369472, %v5619_v19  ;;  %v6764_v25 = vadd.f32 %v1500_v53, %v1373_v8  ;;  %v5163_v43 = vld [vmem:[%s7473_s3 + $0x4a8] ss:$16 sps:$4 sm:$0xff]  }
 0x184   : > { %3848 = vmatprep.subr.bf16.mxu0 %v5138_v1  ;;  %4094 = vmatprep.subr.bf16.mxu1 %v5141_v38  ;;  %v5621_v13 = vpop.eup %5620  ;;  %v1492_v20 = vadd.f32 %v1350_v60, %v1339_v5  ;;  %v5165_v38 = vld [vmem:[%s7473_s3 + $0x4ac] ss:$16 sps:$4 sm:$0xff]  }
 0x185   : > { %3878 = vmatprep.mubr.bf16.mxu0 %v1624_v58  ;;  %4124 = vmatprep.mubr.bf16.mxu1 %v1624_v58  ;;  %v1305_v30 = vmul.bf16 %v1237_v42, %v6591_v56  ;;  %v5623_v36 = vpop.eup %5622  ;;  %v1184_v23 = vadd.bf16 1065369472, %v5621_v13  ;;  %v5150_v56 = vld [vmem:[%s7473_s3 + $0x464] ss:$16 sps:$4 sm:$0xff]   ;;  %v5169_v13 = vld [vmem:[%s7473_s3 + $0x4c8] ss:$16 sps:$4 sm:$0xff]  }
 0x186   : > { %v5625_v37 = vpop.eup %5624  ;;  %v1185_v24 = vadd.bf16 1065369472, %v5623_v36 }
 0x187   : > { %3849 = vmatpush1.bf16.msra.mxu0 %v5136_v49  ;;  %4095 = vmatpush1.bf16.msra.mxu1 %v5139_v0  ;;  %v1360_v22 = vunpack.c.l.bf16 %v1305_v30  ;;  %v1371_v12 = vunpack.c.h.bf16 %v1305_v30  ;;  %5634 = vrcp.bf16 %v1184_v23  ;;  %v1285_v28 = vmul.bf16 1065369472, %v5625_v37  ;;  %v5166_v30 = vld [vmem:[%s7473_s3 + $0x4c0] ss:$16 sps:$4 sm:$0xff]  }
 0x188   : > { %3850 = vmatprep.subr.bf16.mxu0 %v5144_v54  ;;  %4096 = vmatprep.subr.bf16.mxu1 %v5147_v62  ;;  %5636 = vrcp.bf16 %v1185_v24 }
 0x189   : > { %v5627_v21 = vpop.eup %5626  ;;  %v1486_v14 = vadd.f32 %v1485_v18, %v1360_v22  ;;  %v1329_v6 = vmul.bf16 %v1285_v28, %v6611_v11  ;;  %v5168_v11 = vld [vmem:[%s7473_s3 + $0x4c4] ss:$16 sps:$4 sm:$0xff]   ;;  %v5181_v28 = vld [vmem:[%s7473_s3 + $0x508] ss:$16 sps:$4 sm:$0xff]  }
 0x18a   : > { %v5629_v10 = vpop.eup %5628  ;;  %v1239_v7 = vmul.bf16 1065369472, %v5627_v21  ;;  %v5172_v21 = vld [vmem:[%s7473_s3 + $0x4e0] ss:$16 sps:$4 sm:$0xff]  }
 0x18b   : > { %3851 = vmatpush1.bf16.msra.mxu0 %v5142_v44  ;;  %4097 = vmatpush1.bf16.msra.mxu1 %v5145_v55  ;;  %v6792_v15 = vadd.f32 %v1486_v14, %v1371_v12  ;;  %v1195_v39 = vadd.bf16 1065369472, %v5629_v10  ;;  %v5631_v2 = vpop.eup %5630  ;;  %v1406_v54 = vunpack.c.l.bf16 %v1329_v6  ;;  %v1417_v36 = vunpack.c.h.bf16 %v1329_v6  ;;  %v5177_v12 = vld [vmem:[%s7473_s3 + $0x4ec] ss:$16 sps:$4 sm:$0xff]   ;;  %v5175_v14 = vld [vmem:[%s7473_s3 + $0x4e8] ss:$16 sps:$4 sm:$0xff]  }
 0x18c   : > { %3852 = vmatprep.subr.bf16.mxu0 %v5150_v56  ;;  %4098 = vmatprep.subr.bf16.mxu1 %v5153_v46  ;;  %v1306_v27 = vmul.bf16 %v1239_v7, %v6644_v47  ;;  %v1196_v48 = vadd.bf16 1065369472, %v5631_v2  ;;  %v5162_v47 = vld [vmem:[%s7473_s3 + $0x4a4] ss:$16 sps:$4 sm:$0xff]  }
 0x18d   : > { %5638 = vrcp.bf16 %v1195_v39  ;;  %v5633_v8 = vpop.eup %5632  ;;  %v5183_v39 = vld [vmem:[%s7473_s3 + $0x50c] ss:$16 sps:$4 sm:$0xff]   ;;  %v5192_v6 = vld [vmem:[%s7473_s3 + $0x544] ss:$16 sps:$4 sm:$0xff]  }
 0x18e   : > { %v1361_v26 = vunpack.c.l.bf16 %v1306_v27  ;;  %v1372_v51 = vunpack.c.h.bf16 %v1306_v27  ;;  %v1263_v1 = vmul.bf16 1065369472, %v5633_v8  ;;  %5640 = vrcp.bf16 %v1196_v48 }
 0x18f   : > { %3853 = vmatpush1.bf16.msra.mxu0 %v5148_v52  ;;  %4099 = vmatpush1.bf16.msra.mxu1 %v5151_v31  ;;  %v5180_v31 = vld [vmem:[%s7473_s3 + $0x504] ss:$16 sps:$4 sm:$0xff]  }
 0x190   : > { %3854 = vmatprep.subr.bf16.mxu0 %v5156_v9  ;;  %4100 = vmatprep.subr.bf16.mxu1 %v5159_v63  ;;  %v1493_v58 = vadd.f32 %v1492_v20, %v1361_v26  ;;  %v1318_v50 = vmul.bf16 %v1263_v1, %v6666_v45  ;;  %v5171_v45 = vld [vmem:[%s7473_s3 + $0x4cc] ss:$16 sps:$4 sm:$0xff]   ;;  %v5184_v1 = vld [vmem:[%s7473_s3 + $0x520] ss:$16 sps:$4 sm:$0xff]  }
 0x192   : > { %v1494_v53 = vadd.f32 %v1493_v58, %v1372_v51  ;;  %v1384_v19 = vunpack.c.l.bf16 %v1318_v50  ;;  %v1395_v49 = vunpack.c.h.bf16 %v1318_v50  ;;  %v5635_v0 = vpop.eup %5634  ;;  %v5189_v51 = vld [vmem:[%s7473_s3 + $0x52c] ss:$16 sps:$4 sm:$0xff]   ;;  %v1566_v58 = vrot.slane %v6556_v17, 4 }
 0x193   : > { %3855 = vmatpush1.bf16.msra.mxu0 %v5154_v57  ;;  %4101 = vmatpush1.bf16.msra.mxu1 %v5157_v41  ;;  %v5637_v42 = vpop.eup %5636  ;;  %v1259_v33 = vmul.bf16 1065369472, %v5635_v0  ;;  %v5195_v50 = vld [vmem:[%s7473_s3 + $0x54c] ss:$16 sps:$4 sm:$0xff]  }
 0x194   : > { %3856 = vmatprep.subr.bf16.mxu0 %v5162_v47  ;;  %4102 = vmatprep.subr.bf16.mxu1 %v5165_v38  ;;  %v1502_v62 = vadd.f32 %v6764_v25, %v1384_v19  ;;  %v1261_v18 = vmul.bf16 1065369472, %v5637_v42  ;;  %v5174_v25 = vld [vmem:[%s7473_s3 + $0x4e4] ss:$16 sps:$4 sm:$0xff]   ;;  %v5187_v47 = vld [vmem:[%s7473_s3 + $0x528] ss:$16 sps:$4 sm:$0xff]   ;;  %v1567_v19 = vadd.f32 %v1566_v58, %v6556_v17 }
 0x195   : > { %v1316_v55 = vmul.bf16 %v1259_v33, %v6693_v4  ;;  %v5201_v0 = vld [vmem:[%s7473_s3 + $0x56c] ss:$16 sps:$4 sm:$0xff]   ;;  %v5199_v17 = vld [vmem:[%s7473_s3 + $0x568] ss:$16 sps:$4 sm:$0xff]   ;;  %v5204_v42 = vld [vmem:[%s7473_s3 + $0x584] ss:$16 sps:$4 sm:$0xff]  }
 0x196   : > { %v1503_v44 = vadd.f32 %v1502_v62, %v1395_v49  ;;  %v1317_v23 = vmul.bf16 %v1261_v18, %v6695_v16  ;;  %v5198_v49 = vld [vmem:[%s7473_s3 + $0x564] ss:$16 sps:$4 sm:$0xff]   ;;  %v5202_v33 = vld [vmem:[%s7473_s3 + $0x580] ss:$16 sps:$4 sm:$0xff]   ;;  %v5205_v18 = vld [vmem:[%s7473_s3 + $0x588] ss:$16 sps:$4 sm:$0xff]  }
 0x197   : > { %3857 = vmatpush1.bf16.msra.mxu0 %v5160_v29  ;;  %4103 = vmatpush1.bf16.msra.mxu1 %v5163_v43  ;;  %v1382_v56 = vunpack.c.l.bf16 %v1316_v55  ;;  %v1393_v46 = vunpack.c.h.bf16 %v1316_v55  ;;  %v5190_v29 = vld [vmem:[%s7473_s3 + $0x540] ss:$16 sps:$4 sm:$0xff]   ;;  %v5193_v43 = vld [vmem:[%s7473_s3 + $0x548] ss:$16 sps:$4 sm:$0xff]   ;;  %v5255_v58 = vld [vmem:[%s7473_s3 + $0x68c] ss:$16 sps:$4 sm:$0xff]  }
 0x198   : > { %v5639_v22 = vpop.eup %5638  ;;  %3858 = vmatprep.subr.bf16.mxu0 %v5168_v11  ;;  %4104 = vmatprep.subr.bf16.mxu1 %v5171_v45  ;;  %v1504_v37 = vadd.f32 %v1503_v44, %v1406_v54  ;;  %v1383_v24 = vunpack.c.l.bf16 %v1317_v23  ;;  %v1394_v4 = vunpack.c.h.bf16 %v1317_v23  ;;  %v5196_v45 = vld [vmem:[%s7473_s3 + $0x560] ss:$16 sps:$4 sm:$0xff]   ;;  %v1568_v54 = vrot.slane %v1567_v19, 2 }
 0x199   : > { %v1281_v5 = vmul.bf16 1065369472, %v5639_v22  ;;  %v5641_v60 = vpop.eup %5640  ;;  %v1488_v16 = vadd.f32 %v6792_v15, %v1382_v56  ;;  %v5208_v55 = vld [vmem:[%s7473_s3 + $0x5a0] ss:$16 sps:$4 sm:$0xff]   ;;  %v5211_v22 = vld [vmem:[%s7473_s3 + $0x5a8] ss:$16 sps:$4 sm:$0xff]  }
 0x19a   : > { %v6848_v10 = vadd.f32 %v1504_v37, %v1417_v36  ;;  %v1283_v52 = vmul.bf16 1065369472, %v5641_v60  ;;  %v1495_v2 = vadd.f32 %v1494_v53, %v1383_v24  ;;  %v1584_v53 = vrot.slane %v6703_v3, 4  ;;  %v5214_v56 = vld [vmem:[%s7473_s3 + $0x5c0] ss:$16 sps:$4 sm:$0xff]  }
 0x19b   : > { %3859 = vmatpush1.bf16.msra.mxu0 %v5166_v30  ;;  %4105 = vmatpush1.bf16.msra.mxu1 %v5169_v13  ;;  %v1327_v7 = vmul.bf16 %v1281_v5, %v6732_v61  ;;  %v1489_v9 = vadd.f32 %v1488_v16, %v1393_v46  ;;  %v5178_v61 = vld [vmem:[%s7473_s3 + $0x500] ss:$16 sps:$4 sm:$0xff]   ;;  %v5210_v30 = vld [vmem:[%s7473_s3 + $0x5a4] ss:$16 sps:$4 sm:$0xff]   ;;  %v5213_v13 = vld [vmem:[%s7473_s3 + $0x5ac] ss:$16 sps:$4 sm:$0xff]   ;;  %v1569_v36 = vadd.f32 %v1568_v54, %v1567_v19 }
 0x19c   : > { %3860 = vmatprep.subr.bf16.mxu0 %v5174_v25  ;;  %4106 = vmatprep.subr.bf16.mxu1 %v5177_v12  ;;  %v1328_v27 = vmul.bf16 %v1283_v52, %v6741_v59  ;;  %v1496_v15 = vadd.f32 %v1495_v2, %v1394_v4  ;;  %v5186_v59 = vld [vmem:[%s7473_s3 + $0x524] ss:$16 sps:$4 sm:$0xff]   ;;  %v1585_v11 = vadd.f32 %v1584_v53, %v6703_v3  ;;  %v5207_v3 = vld [vmem:[%s7473_s3 + $0x58c] ss:$16 sps:$4 sm:$0xff]   ;;  %v5217_v46 = vld [vmem:[%s7473_s3 + $0x5c8] ss:$16 sps:$4 sm:$0xff]  }
 0x19d   : > { %v1404_v63 = vunpack.c.l.bf16 %v1327_v7  ;;  %v1415_v20 = vunpack.c.h.bf16 %v1327_v7  ;;  %v5216_v25 = vld [vmem:[%s7473_s3 + $0x5c4] ss:$16 sps:$4 sm:$0xff]   ;;  %v5219_v12 = vld [vmem:[%s7473_s3 + $0x5cc] ss:$16 sps:$4 sm:$0xff]   ;;  %v1570_v23 = vrot.slane %v1569_v36, 1 }
 0x19e   : > { %v1405_v8 = vunpack.c.l.bf16 %v1328_v27  ;;  %v1416_v26 = vunpack.c.h.bf16 %v1328_v27  ;;  %v1586_v62 = vrot.slane %v1585_v11, 2  ;;  %v5222_v5 = vld [vmem:[%s7473_s3 + $0x5e4] ss:$16 sps:$4 sm:$0xff]   ;;  %v5225_v60 = vld [vmem:[%s7473_s3 + $0x5ec] ss:$16 sps:$4 sm:$0xff]  }
 0x19f   : > { %3861 = vmatpush1.bf16.msra.mxu0 %v5172_v21  ;;  %4107 = vmatpush1.bf16.msra.mxu1 %v5175_v14  ;;  %v1490_v48 = vadd.f32 %v1489_v9, %v1404_v63  ;;  %v1571_v24 = vadd.f32 %v1570_v23, %v1569_v36  ;;  %v5220_v21 = vld [vmem:[%s7473_s3 + $0x5e0] ss:$16 sps:$4 sm:$0xff]   ;;  %v5223_v14 = vld [vmem:[%s7473_s3 + $0x5e8] ss:$16 sps:$4 sm:$0xff]   ;;  %v5228_v7 = vld [vmem:[%s7473_s3 + $0x604] ss:$16 sps:$4 sm:$0xff]  }
 0x1a0   : > { %3862 = vmatprep.subr.bf16.mxu0 %v5180_v31  ;;  %4108 = vmatprep.subr.bf16.mxu1 %v5183_v39  ;;  %v1497_v41 = vadd.f32 %v1496_v15, %v1405_v8  ;;  %v1587_v44 = vadd.f32 %v1586_v62, %v1585_v11  ;;  %v5231_v52 = vld [vmem:[%s7473_s3 + $0x60c] ss:$16 sps:$4 sm:$0xff]   ;;  %v5226_v39 = vld [vmem:[%s7473_s3 + $0x600] ss:$16 sps:$4 sm:$0xff]   ;;  %v5229_v2 = vld [vmem:[%s7473_s3 + $0x608] ss:$16 sps:$4 sm:$0xff]  }
 0x1a1   : > { %v6871_v57 = vadd.f32 %v1490_v48, %v1415_v20  ;;  %v1612_v16 = vmul.f32 0.015625, %v1571_v24  ;;  %v5234_v63 = vld [vmem:[%s7473_s3 + $0x624] ss:$16 sps:$4 sm:$0xff]   ;;  %v5237_v20 = vld [vmem:[%s7473_s3 + $0x62c] ss:$16 sps:$4 sm:$0xff]  }
 0x1a2   : > { %v6879_v38 = vadd.f32 %v1497_v41, %v1416_v26  ;;  %v1588_v37 = vrot.slane %v1587_v44, 1  ;;  %v5232_v15 = vld [vmem:[%s7473_s3 + $0x620] ss:$16 sps:$4 sm:$0xff]   ;;  %v5243_v48 = vld [vmem:[%s7473_s3 + $0x64c] ss:$16 sps:$4 sm:$0xff]  }
 0x1a3   : > { %3863 = vmatpush1.bf16.msra.mxu0 %v5178_v61  ;;  %4109 = vmatpush1.bf16.msra.mxu1 %v5181_v28  ;;  %v1623_v9 = vpack.c.bf16 %v1612_v16, %v1612_v16  ;;  %v5235_v61 = vld [vmem:[%s7473_s3 + $0x628] ss:$16 sps:$4 sm:$0xff]   ;;  %v5240_v28 = vld [vmem:[%s7473_s3 + $0x644] ss:$16 sps:$4 sm:$0xff]   ;;  %v5238_v8 = vld [vmem:[%s7473_s3 + $0x640] ss:$16 sps:$4 sm:$0xff]  }
 0x1a4   : > { %3864 = vmatprep.subr.bf16.mxu0 %v5186_v59  ;;  %4110 = vmatprep.subr.bf16.mxu1 %v5189_v51  ;;  %v1589_v4 = vadd.f32 %v1588_v37, %v1587_v44  ;;  %v5241_v26 = vld [vmem:[%s7473_s3 + $0x648] ss:$16 sps:$4 sm:$0xff]   ;;  %v5246_v59 = vld [vmem:[%s7473_s3 + $0x664] ss:$16 sps:$4 sm:$0xff]   ;;  %v5249_v51 = vld [vmem:[%s7473_s3 + $0x66c] ss:$16 sps:$4 sm:$0xff]  }
 0x1a5   : > { %v5244_v41 = vld [vmem:[%s7473_s3 + $0x660] ss:$16 sps:$4 sm:$0xff]   ;;  %v5258_v53 = vld [vmem:[%s7473_s3 + $0x6a4] ss:$16 sps:$4 sm:$0xff]   ;;  %v5259_v19 = vld [vmem:[%s7473_s3 + $0x6a8] ss:$16 sps:$4 sm:$0xff]  }
 0x1a6   : > { %v1615_v31 = vmul.f32 0.015625, %v1589_v4  ;;  %v5262_v11 = vld [vmem:[%s7473_s3 + $0x6c0] ss:$16 sps:$4 sm:$0xff]   ;;  %v5271_v54 = vld [vmem:[%s7473_s3 + $0x6e8] ss:$16 sps:$4 sm:$0xff]   ;;  %v1596_v23 = vrot.slane %v6879_v38, 4 }
 0x1a7   : > { %3865 = vmatpush1.bf16.msra.mxu0 %v5184_v1  ;;  %4111 = vmatpush1.bf16.msra.mxu1 %v5187_v47  ;;  %v5247_v1 = vld [vmem:[%s7473_s3 + $0x668] ss:$16 sps:$4 sm:$0xff]   ;;  %v5252_v47 = vld [vmem:[%s7473_s3 + $0x684] ss:$16 sps:$4 sm:$0xff]   ;;  %v5285_v36 = vld [vmem:[%s7473_s3 + $0x72c] ss:$16 sps:$4 sm:$0xff]  }
 0x1a8   : > { %3866 = vmatprep.subr.bf16.mxu0 %v5192_v6  ;;  %4112 = vmatprep.subr.bf16.mxu1 %v5195_v50  ;;  %v1626_v27 = vpack.c.bf16 %v1615_v31, %v1615_v31  ;;  %v5250_v6 = vld [vmem:[%s7473_s3 + $0x680] ss:$16 sps:$4 sm:$0xff]   ;;  %v5253_v50 = vld [vmem:[%s7473_s3 + $0x688] ss:$16 sps:$4 sm:$0xff]   ;;  %v5276_v62 = vld [vmem:[%s7473_s3 + $0x704] ss:$16 sps:$4 sm:$0xff]   ;;  %v1597_v24 = vadd.f32 %v1596_v23, %v6879_v38 }
 0x1a9   : > { %v5280_v44 = vld [vmem:[%s7473_s3 + $0x720] ss:$16 sps:$4 sm:$0xff]   ;;  %v5303_v38 = vld [vmem:[%s7473_s3 + $0x78c] ss:$16 sps:$4 sm:$0xff]   ;;  %v5306_v31 = vld [vmem:[%s7473_s3 + $0x7a4] ss:$16 sps:$4 sm:$0xff]  }
 0x1aa   : > { %v5286_v37 = vld [vmem:[%s7473_s3 + $0x740] ss:$16 sps:$4 sm:$0xff]   ;;  %v1598_v16 = vrot.slane %v1597_v24, 2 }
 0x1ab   : > { %3867 = vmatpush1.bf16.msra.mxu0 %v5190_v29  ;;  %4113 = vmatpush1.bf16.msra.mxu1 %v5193_v43  ;;  %v5261_v29 = vld [vmem:[%s7473_s3 + $0x6ac] ss:$16 sps:$4 sm:$0xff]   ;;  %v5256_v43 = vld [vmem:[%s7473_s3 + $0x6a0] ss:$16 sps:$4 sm:$0xff]  }
 0x1ac   : > { %3868 = vmatprep.subr.bf16.mxu0 %v5198_v49  ;;  %4114 = vmatprep.subr.bf16.mxu1 %v5201_v0  ;;  %v5264_v49 = vld [vmem:[%s7473_s3 + $0x6c4] ss:$16 sps:$4 sm:$0xff]   ;;  %v5267_v0 = vld [vmem:[%s7473_s3 + $0x6cc] ss:$16 sps:$4 sm:$0xff]   ;;  %v5292_v4 = vld [vmem:[%s7473_s3 + $0x760] ss:$16 sps:$4 sm:$0xff]  }
 0x1ad   : > { %v5352_v23 = vld [vmem:[%s7473_s3 + $0x8a0] ss:$16 sps:$4 sm:$0xff]  }
 0x1af   : > { %3869 = vmatpush1.bf16.msra.mxu0 %v5196_v45  ;;  %4115 = vmatpush1.bf16.msra.mxu1 %v5199_v17  ;;  %v5265_v45 = vld [vmem:[%s7473_s3 + $0x6c8] ss:$16 sps:$4 sm:$0xff]   ;;  %v5270_v17 = vld [vmem:[%s7473_s3 + $0x6e4] ss:$16 sps:$4 sm:$0xff]  }
 0x1b0   : > { %3870 = vmatprep.subr.bf16.mxu0 %v5204_v42  ;;  %4116 = vmatprep.subr.bf16.mxu1 %v5207_v3  ;;  %v5273_v42 = vld [vmem:[%s7473_s3 + $0x6ec] ss:$16 sps:$4 sm:$0xff]   ;;  %v5268_v3 = vld [vmem:[%s7473_s3 + $0x6e0] ss:$16 sps:$4 sm:$0xff]  }
 0x1b3   : > { %3871 = vmatpush1.bf16.msra.mxu0 %v5202_v33  ;;  %4117 = vmatpush1.bf16.msra.mxu1 %v5205_v18  ;;  %v5279_v33 = vld [vmem:[%s7473_s3 + $0x70c] ss:$16 sps:$4 sm:$0xff]   ;;  %v5274_v18 = vld [vmem:[%s7473_s3 + $0x700] ss:$16 sps:$4 sm:$0xff]  }
 0x1b4   : > { %3872 = vmatprep.subr.bf16.mxu0 %v5210_v30  ;;  %4118 = vmatprep.subr.bf16.mxu1 %v5213_v13  ;;  %v5277_v30 = vld [vmem:[%s7473_s3 + $0x708] ss:$16 sps:$4 sm:$0xff]   ;;  %v5282_v13 = vld [vmem:[%s7473_s3 + $0x724] ss:$16 sps:$4 sm:$0xff]  }
 0x1b7   : > { %3873 = vmatpush1.bf16.msra.mxu0 %v5208_v55  ;;  %4119 = vmatpush1.bf16.msra.mxu1 %v5211_v22  ;;  %v5283_v55 = vld [vmem:[%s7473_s3 + $0x728] ss:$16 sps:$4 sm:$0xff]   ;;  %v1578_v22 = vrot.slane %v6691_v40, 4 }
 0x1b8   : > { %3874 = vmatprep.subr.bf16.mxu0 %v5216_v25  ;;  %4120 = vmatprep.subr.bf16.mxu1 %v5219_v12  ;;  %v5288_v25 = vld [vmem:[%s7473_s3 + $0x744] ss:$16 sps:$4 sm:$0xff]   ;;  %v5291_v12 = vld [vmem:[%s7473_s3 + $0x74c] ss:$16 sps:$4 sm:$0xff]  }
 0x1bb   : > { %3875 = vmatpush1.bf16.msra.mxu0 %v5214_v56  ;;  %4121 = vmatpush1.bf16.msra.mxu1 %v5217_v46  ;;  %v5289_v56 = vld [vmem:[%s7473_s3 + $0x748] ss:$16 sps:$4 sm:$0xff]   ;;  %v1579_v46 = vadd.f32 %v1578_v22, %v6691_v40 }
 0x1bc   : > { %3876 = vmatprep.subr.bf16.mxu0 %v5222_v5  ;;  %4122 = vmatprep.subr.bf16.mxu1 %v5225_v60  ;;  %v5294_v5 = vld [vmem:[%s7473_s3 + $0x764] ss:$16 sps:$4 sm:$0xff]   ;;  %v5297_v60 = vld [vmem:[%s7473_s3 + $0x76c] ss:$16 sps:$4 sm:$0xff]   ;;  %v5295_v40 = vld [vmem:[%s7473_s3 + $0x768] ss:$16 sps:$4 sm:$0xff]  }
 0x1bd   : > { %v5349_v22 = vld [vmem:[%s7473_s3 + $0x888] ss:$16 sps:$4 sm:$0xff]  }
 0x1bf   : > { %3877 = vmatpush1.bf16.msra.mxu0 %v5220_v21  ;;  %4123 = vmatpush1.bf16.msra.mxu1 %v5223_v14  ;;  %v5300_v21 = vld [vmem:[%s7473_s3 + $0x784] ss:$16 sps:$4 sm:$0xff]   ;;  %v1580_v14 = vrot.slane %v1579_v46, 2 }
 0x1c0   : > { %3887 = vmatprep.subr.bf16.mxu0 %v5228_v7  ;;  %4133 = vmatprep.subr.bf16.mxu1 %v5231_v52  ;;  %v5298_v7 = vld [vmem:[%s7473_s3 + $0x780] ss:$16 sps:$4 sm:$0xff]   ;;  %v5301_v52 = vld [vmem:[%s7473_s3 + $0x788] ss:$16 sps:$4 sm:$0xff]  }
 0x1c2   : > { %3879 = vmatmul.mubr.bf16.vlgmr.msra.gmra.mrb[48].mxu0 %v1623_v9  ;;  %4125 = vmatmul.mubr.bf16.vlgmr.msra.gmra.mrb[40].mxu1 %v1623_v9  ;;  %v1599_v9 = vadd.f32 %v1598_v16, %v1597_v24  ;;  %v5366_v24 = vld [vmem:[%s7473_s3 + $0x8e4] ss:$16 sps:$4 sm:$0xff]   ;;  %v5370_v16 = vld [vmem:[%s7473_s3 + $0x900] ss:$16 sps:$4 sm:$0xff]  }
 0x1c3   : > { %3888 = vmatpush1.bf16.msra.mxu0 %v5226_v39  ;;  %4134 = vmatpush1.bf16.msra.mxu1 %v5229_v2  ;;  %v5309_v39 = vld [vmem:[%s7473_s3 + $0x7ac] ss:$16 sps:$4 sm:$0xff]   ;;  %v1581_v2 = vadd.f32 %v1580_v14, %v1579_v46 }
 0x1c4   : > { %3889 = vmatprep.subr.bf16.mxu0 %v5234_v63  ;;  %4135 = vmatprep.subr.bf16.mxu1 %v5237_v20  ;;  %v5304_v63 = vld [vmem:[%s7473_s3 + $0x7a0] ss:$16 sps:$4 sm:$0xff]   ;;  %v5307_v20 = vld [vmem:[%s7473_s3 + $0x7a8] ss:$16 sps:$4 sm:$0xff]   ;;  %v5363_v46 = vld [vmem:[%s7473_s3 + $0x8cc] ss:$16 sps:$4 sm:$0xff]  }
 0x1c5   : > { %3919 = vmatprep.mubr.bf16.mxu0 %v1626_v27  ;;  %4165 = vmatprep.mubr.bf16.mxu1 %v1626_v27  ;;  %v5312_v27 = vld [vmem:[%s7473_s3 + $0x7c4] ss:$16 sps:$4 sm:$0xff]   ;;  %v5375_v14 = vld [vmem:[%s7473_s3 + $0x90c] ss:$16 sps:$4 sm:$0xff]  }
 0x1c7   : > { %3890 = vmatpush1.bf16.msra.mxu0 %v5232_v15  ;;  %4136 = vmatpush1.bf16.msra.mxu1 %v5235_v61  ;;  %v5315_v15 = vld [vmem:[%s7473_s3 + $0x7cc] ss:$16 sps:$4 sm:$0xff]   ;;  %v1582_v61 = vrot.slane %v1581_v2, 1 }
 0x1c8   : > { %3891 = vmatprep.subr.bf16.mxu0 %v5240_v28  ;;  %4137 = vmatprep.subr.bf16.mxu1 %v5243_v48  ;;  %v1600_v28 = vrot.slane %v1599_v9, 1  ;;  %v5310_v48 = vld [vmem:[%s7473_s3 + $0x7c0] ss:$16 sps:$4 sm:$0xff]  }
 0x1cb   : > { %3892 = vmatpush1.bf16.msra.mxu0 %v5238_v8  ;;  %4138 = vmatpush1.bf16.msra.mxu1 %v5241_v26  ;;  %v5313_v8 = vld [vmem:[%s7473_s3 + $0x7c8] ss:$16 sps:$4 sm:$0xff]   ;;  %v5318_v26 = vld [vmem:[%s7473_s3 + $0x7e4] ss:$16 sps:$4 sm:$0xff]  }
 0x1cc   : > { %3893 = vmatprep.subr.bf16.mxu0 %v5246_v59  ;;  %4139 = vmatprep.subr.bf16.mxu1 %v5249_v51  ;;  %v5321_v59 = vld [vmem:[%s7473_s3 + $0x7ec] ss:$16 sps:$4 sm:$0xff]   ;;  %v1583_v51 = vadd.f32 %v1582_v61, %v1581_v2  ;;  %v1590_v2 = vrot.slane %v6871_v57, 4  ;;  %v5385_v61 = vld [vmem:[%s7473_s3 + $0x948] ss:$16 sps:$4 sm:$0xff]  }
 0x1cf   : > { %3894 = vmatpush1.bf16.msra.mxu0 %v5244_v41  ;;  %4140 = vmatpush1.bf16.msra.mxu1 %v5247_v1  ;;  %v1601_v41 = vadd.f32 %v1600_v28, %v1599_v9  ;;  %v5316_v1 = vld [vmem:[%s7473_s3 + $0x7e0] ss:$16 sps:$4 sm:$0xff]   ;;  %v5379_v9 = vld [vmem:[%s7473_s3 + $0x928] ss:$16 sps:$4 sm:$0xff]   ;;  %v5390_v28 = vld [vmem:[%s7473_s3 + $0x964] ss:$16 sps:$4 sm:$0xff]  }
 0x1d0   : > { %3895 = vmatprep.subr.bf16.mxu0 %v5252_v47  ;;  %4141 = vmatprep.subr.bf16.mxu1 %v5255_v58  ;;  %v5319_v47 = vld [vmem:[%s7473_s3 + $0x7e8] ss:$16 sps:$4 sm:$0xff]   ;;  %v1614_v58 = vmul.f32 0.015625, %v1583_v51  ;;  %v5399_v51 = vld [vmem:[%s7473_s3 + $0x98c] ss:$16 sps:$4 sm:$0xff]  }
 0x1d3   : > { %3896 = vmatpush1.bf16.msra.mxu0 %v5250_v6  ;;  %4142 = vmatpush1.bf16.msra.mxu1 %v5253_v50  ;;  %v5324_v6 = vld [vmem:[%s7473_s3 + $0x804] ss:$16 sps:$4 sm:$0xff]   ;;  %v5327_v50 = vld [vmem:[%s7473_s3 + $0x80c] ss:$16 sps:$4 sm:$0xff]  }
 0x1d4   : > { %3897 = vmatprep.subr.bf16.mxu0 %v5258_v53  ;;  %4143 = vmatprep.subr.bf16.mxu1 %v5261_v29  ;;  %v1617_v53 = vmul.f32 0.015625, %v1601_v41  ;;  %v5322_v29 = vld [vmem:[%s7473_s3 + $0x800] ss:$16 sps:$4 sm:$0xff]  }
 0x1d5   : > { %v5394_v41 = vld [vmem:[%s7473_s3 + $0x980] ss:$16 sps:$4 sm:$0xff]  }
 0x1d7   : > { %3898 = vmatpush1.bf16.msra.mxu0 %v5256_v43  ;;  %4144 = vmatpush1.bf16.msra.mxu1 %v5259_v19  ;;  %v1625_v43 = vpack.c.bf16 %v1614_v58, %v1614_v58  ;;  %v5325_v19 = vld [vmem:[%s7473_s3 + $0x808] ss:$16 sps:$4 sm:$0xff]  }
 0x1d8   : > { %3899 = vmatprep.subr.bf16.mxu0 %v5264_v49  ;;  %4145 = vmatprep.subr.bf16.mxu1 %v5267_v0  ;;  %v1628_v49 = vpack.c.bf16 %v1617_v53, %v1617_v53  ;;  %v5330_v0 = vld [vmem:[%s7473_s3 + $0x824] ss:$16 sps:$4 sm:$0xff]   ;;  %v5403_v53 = vld [vmem:[%s7473_s3 + $0x9a8] ss:$16 sps:$4 sm:$0xff]  }
 0x1db   : > { %3900 = vmatpush1.bf16.msra.mxu0 %v5262_v11  ;;  %4146 = vmatpush1.bf16.msra.mxu1 %v5265_v45  ;;  %v5333_v11 = vld [vmem:[%s7473_s3 + $0x82c] ss:$16 sps:$4 sm:$0xff]   ;;  %v5328_v45 = vld [vmem:[%s7473_s3 + $0x820] ss:$16 sps:$4 sm:$0xff]  }
 0x1dc   : > { %3901 = vmatprep.subr.bf16.mxu0 %v5270_v17  ;;  %4147 = vmatprep.subr.bf16.mxu1 %v5273_v42  ;;  %v5331_v17 = vld [vmem:[%s7473_s3 + $0x828] ss:$16 sps:$4 sm:$0xff]   ;;  %v5336_v42 = vld [vmem:[%s7473_s3 + $0x844] ss:$16 sps:$4 sm:$0xff]  }
 0x1df   : > { %3902 = vmatpush1.bf16.msra.mxu0 %v5268_v3  ;;  %4148 = vmatpush1.bf16.msra.mxu1 %v5271_v54  ;;  %v5339_v3 = vld [vmem:[%s7473_s3 + $0x84c] ss:$16 sps:$4 sm:$0xff]   ;;  %v5334_v54 = vld [vmem:[%s7473_s3 + $0x840] ss:$16 sps:$4 sm:$0xff]  }
 0x1e0   : > { %3903 = vmatprep.subr.bf16.mxu0 %v5276_v62  ;;  %4149 = vmatprep.subr.bf16.mxu1 %v5279_v33  ;;  %v5337_v62 = vld [vmem:[%s7473_s3 + $0x848] ss:$16 sps:$4 sm:$0xff]   ;;  %v5342_v33 = vld [vmem:[%s7473_s3 + $0x864] ss:$16 sps:$4 sm:$0xff]  }
 0x1e3   : > { %3904 = vmatpush1.bf16.msra.mxu0 %v5274_v18  ;;  %4150 = vmatpush1.bf16.msra.mxu1 %v5277_v30  ;;  %v5345_v18 = vld [vmem:[%s7473_s3 + $0x86c] ss:$16 sps:$4 sm:$0xff]   ;;  %v5340_v30 = vld [vmem:[%s7473_s3 + $0x860] ss:$16 sps:$4 sm:$0xff]  }
 0x1e4   : > { %3905 = vmatprep.subr.bf16.mxu0 %v5282_v13  ;;  %4151 = vmatprep.subr.bf16.mxu1 %v5285_v36  ;;  %v5343_v13 = vld [vmem:[%s7473_s3 + $0x868] ss:$16 sps:$4 sm:$0xff]   ;;  %v5348_v36 = vld [vmem:[%s7473_s3 + $0x884] ss:$16 sps:$4 sm:$0xff]  }
 0x1e7   : > { %3906 = vmatpush1.bf16.msra.mxu0 %v5280_v44  ;;  %4152 = vmatpush1.bf16.msra.mxu1 %v5283_v55  ;;  %v5351_v44 = vld [vmem:[%s7473_s3 + $0x88c] ss:$16 sps:$4 sm:$0xff]   ;;  %v5346_v55 = vld [vmem:[%s7473_s3 + $0x880] ss:$16 sps:$4 sm:$0xff]  }
 0x1e8   : > { %3907 = vmatprep.subr.bf16.mxu0 %v5288_v25  ;;  %4153 = vmatprep.subr.bf16.mxu1 %v5291_v12  ;;  %v5354_v25 = vld [vmem:[%s7473_s3 + $0x8a4] ss:$16 sps:$4 sm:$0xff]   ;;  %v5357_v12 = vld [vmem:[%s7473_s3 + $0x8ac] ss:$16 sps:$4 sm:$0xff]  }
 0x1eb   : > { %3908 = vmatpush1.bf16.msra.mxu0 %v5286_v37  ;;  %4154 = vmatpush1.bf16.msra.mxu1 %v5289_v56  ;;  %v5355_v37 = vld [vmem:[%s7473_s3 + $0x8a8] ss:$16 sps:$4 sm:$0xff]   ;;  %v5360_v56 = vld [vmem:[%s7473_s3 + $0x8c4] ss:$16 sps:$4 sm:$0xff]  }
 0x1ec   : > { %3909 = vmatprep.subr.bf16.mxu0 %v5294_v5  ;;  %4155 = vmatprep.subr.bf16.mxu1 %v5297_v60  ;;  %v5358_v5 = vld [vmem:[%s7473_s3 + $0x8c0] ss:$16 sps:$4 sm:$0xff]   ;;  %v5361_v60 = vld [vmem:[%s7473_s3 + $0x8c8] ss:$16 sps:$4 sm:$0xff]  }
 0x1ef   : > { %3910 = vmatpush1.bf16.msra.mxu0 %v5292_v4  ;;  %4156 = vmatpush1.bf16.msra.mxu1 %v5295_v40  ;;  %v5369_v4 = vld [vmem:[%s7473_s3 + $0x8ec] ss:$16 sps:$4 sm:$0xff]   ;;  %v5364_v40 = vld [vmem:[%s7473_s3 + $0x8e0] ss:$16 sps:$4 sm:$0xff]  }
 0x1f0   : > { %3911 = vmatprep.subr.bf16.mxu0 %v5300_v21  ;;  %4157 = vmatprep.subr.bf16.mxu1 %v5303_v38  ;;  %v5367_v21 = vld [vmem:[%s7473_s3 + $0x8e8] ss:$16 sps:$4 sm:$0xff]   ;;  %v5372_v38 = vld [vmem:[%s7473_s3 + $0x904] ss:$16 sps:$4 sm:$0xff]  }
 0x1f3   : > { %3912 = vmatpush1.bf16.msra.mxu0 %v5298_v7  ;;  %4158 = vmatpush1.bf16.msra.mxu1 %v5301_v52  ;;  %v5373_v7 = vld [vmem:[%s7473_s3 + $0x908] ss:$16 sps:$4 sm:$0xff]   ;;  %v5378_v52 = vld [vmem:[%s7473_s3 + $0x924] ss:$16 sps:$4 sm:$0xff]  }
 0x1f4   : > { %3913 = vmatprep.subr.bf16.mxu0 %v5306_v31  ;;  %4159 = vmatprep.subr.bf16.mxu1 %v5309_v39  ;;  %v5381_v31 = vld [vmem:[%s7473_s3 + $0x92c] ss:$16 sps:$4 sm:$0xff]   ;;  %v5376_v39 = vld [vmem:[%s7473_s3 + $0x920] ss:$16 sps:$4 sm:$0xff]  }
 0x1f7   : > { %3914 = vmatpush1.bf16.msra.mxu0 %v5304_v63  ;;  %4160 = vmatpush1.bf16.msra.mxu1 %v5307_v20  ;;  %v5384_v63 = vld [vmem:[%s7473_s3 + $0x944] ss:$16 sps:$4 sm:$0xff]   ;;  %v5387_v20 = vld [vmem:[%s7473_s3 + $0x94c] ss:$16 sps:$4 sm:$0xff]  }
 0x1f8   : > { %3915 = vmatprep.subr.bf16.mxu0 %v5312_v27  ;;  %4161 = vmatprep.subr.bf16.mxu1 %v5315_v15  ;;  %v5382_v27 = vld [vmem:[%s7473_s3 + $0x940] ss:$16 sps:$4 sm:$0xff]   ;;  %v1591_v15 = vadd.f32 %v1590_v2, %v6871_v57  ;;  %v5451_v2 = vld [vmem:[%s7473_s3 + $0xaa8] ss:$16 sps:$4 sm:$0xff]  }
 0x1f9   : > { %v5388_v57 = vld [vmem:[%s7473_s3 + $0x960] ss:$16 sps:$4 sm:$0xff]  }
 0x1fb   : > { %3916 = vmatpush1.bf16.msra.mxu0 %v5310_v48  ;;  %4162 = vmatpush1.bf16.msra.mxu1 %v5313_v8  ;;  %v5393_v48 = vld [vmem:[%s7473_s3 + $0x96c] ss:$16 sps:$4 sm:$0xff]   ;;  %v5391_v8 = vld [vmem:[%s7473_s3 + $0x968] ss:$16 sps:$4 sm:$0xff]  }
 0x1fc   : > { %3917 = vmatprep.subr.bf16.mxu0 %v5318_v26  ;;  %4163 = vmatprep.subr.bf16.mxu1 %v5321_v59  ;;  %v5396_v26 = vld [vmem:[%s7473_s3 + $0x984] ss:$16 sps:$4 sm:$0xff]   ;;  %v1592_v59 = vrot.slane %v1591_v15, 2 }
 0x1fe   : > { %v1593_v58 = vadd.f32 %v1592_v59, %v1591_v15  ;;  %v5457_v15 = vld [vmem:[%s7473_s3 + $0xac8] ss:$16 sps:$4 sm:$0xff]  }
 0x1ff   : > { %3918 = vmatpush1.bf16.msra.mxu0 %v5316_v1  ;;  %4164 = vmatpush1.bf16.msra.mxu1 %v5319_v47  ;;  %v5397_v1 = vld [vmem:[%s7473_s3 + $0x988] ss:$16 sps:$4 sm:$0xff]   ;;  %v5402_v47 = vld [vmem:[%s7473_s3 + $0x9a4] ss:$16 sps:$4 sm:$0xff]  }
 0x200   : > { %3928 = vmatprep.subr.bf16.mxu0 %v5324_v6  ;;  %4174 = vmatprep.subr.bf16.mxu1 %v5327_v50  ;;  %v5405_v6 = vld [vmem:[%s7473_s3 + $0x9ac] ss:$16 sps:$4 sm:$0xff]   ;;  %v5400_v50 = vld [vmem:[%s7473_s3 + $0x9a0] ss:$16 sps:$4 sm:$0xff]  }
 0x202   : > { %3920 = vmatmul.mubr.bf16.vlgmr.msra.gmra.mrb[48].mxu0 %v1625_v43  ;;  %4166 = vmatmul.mubr.bf16.vlgmr.msra.gmra.mrb[40].mxu1 %v1625_v43  ;;  %v1594_v43 = vrot.slane %v1593_v58, 1 }
 0x203   : > { %3929 = vmatpush1.bf16.msra.mxu0 %v5322_v29  ;;  %3960 = vmatprep.mubr.bf16.mxu0 %v1628_v49  ;;  %v5408_v29 = vld [vmem:[%s7473_s3 + $0x9c4] ss:$16 sps:$4 sm:$0xff]  }
 0x204   : > { %4175 = vmatpush1.bf16.msra.mxu1 %v5325_v19  ;;  %4206 = vmatprep.mubr.bf16.mxu1 %v1628_v49  ;;  %v5411_v19 = vld [vmem:[%s7473_s3 + $0x9cc] ss:$16 sps:$4 sm:$0xff]   ;;  %v5406_v49 = vld [vmem:[%s7473_s3 + $0x9c0] ss:$16 sps:$4 sm:$0xff]  }
 0x205   : > { %3930 = vmatprep.subr.bf16.mxu0 %v5330_v0  ;;  %4176 = vmatprep.subr.bf16.mxu1 %v5333_v11  ;;  %v5409_v0 = vld [vmem:[%s7473_s3 + $0x9c8] ss:$16 sps:$4 sm:$0xff]   ;;  %v5414_v11 = vld [vmem:[%s7473_s3 + $0x9e4] ss:$16 sps:$4 sm:$0xff]  }
 0x207   : > { %3931 = vmatpush1.bf16.msra.mxu0 %v5328_v45  ;;  %v1595_v45 = vadd.f32 %v1594_v43, %v1593_v58 }
 0x208   : > { %4177 = vmatpush1.bf16.msra.mxu1 %v5331_v17  ;;  %3932 = vmatprep.subr.bf16.mxu0 %v5336_v42  ;;  %v5417_v17 = vld [vmem:[%s7473_s3 + $0x9ec] ss:$16 sps:$4 sm:$0xff]   ;;  %v5412_v42 = vld [vmem:[%s7473_s3 + $0x9e0] ss:$16 sps:$4 sm:$0xff]  }
 0x209   : > { %4178 = vmatprep.subr.bf16.mxu1 %v5339_v3  ;;  %v5415_v3 = vld [vmem:[%s7473_s3 + $0x9e8] ss:$16 sps:$4 sm:$0xff]  }
 0x20b   : > { %3933 = vmatpush1.bf16.msra.mxu0 %v5334_v54  ;;  %v1616_v54 = vmul.f32 0.015625, %v1595_v45 }
 0x20c   : > { %4179 = vmatpush1.bf16.msra.mxu1 %v5337_v62  ;;  %3934 = vmatprep.subr.bf16.mxu0 %v5342_v33  ;;  %v5420_v62 = vld [vmem:[%s7473_s3 + $0xa04] ss:$16 sps:$4 sm:$0xff]   ;;  %v5423_v33 = vld [vmem:[%s7473_s3 + $0xa0c] ss:$16 sps:$4 sm:$0xff]  }
 0x20d   : > { %4180 = vmatprep.subr.bf16.mxu1 %v5345_v18  ;;  %v5418_v18 = vld [vmem:[%s7473_s3 + $0xa00] ss:$16 sps:$4 sm:$0xff]  }
 0x20f   : > { %3935 = vmatpush1.bf16.msra.mxu0 %v5340_v30  ;;  %v1627_v30 = vpack.c.bf16 %v1616_v54, %v1616_v54 }
 0x210   : > { %4181 = vmatpush1.bf16.msra.mxu1 %v5343_v13  ;;  %3936 = vmatprep.subr.bf16.mxu0 %v5348_v36  ;;  %v5421_v13 = vld [vmem:[%s7473_s3 + $0xa08] ss:$16 sps:$4 sm:$0xff]   ;;  %v5426_v36 = vld [vmem:[%s7473_s3 + $0xa24] ss:$16 sps:$4 sm:$0xff]  }
 0x211   : > { %4182 = vmatprep.subr.bf16.mxu1 %v5351_v44  ;;  %v5429_v44 = vld [vmem:[%s7473_s3 + $0xa2c] ss:$16 sps:$4 sm:$0xff]  }
 0x213   : > { %3937 = vmatpush1.bf16.msra.mxu0 %v5346_v55  ;;  %v5424_v55 = vld [vmem:[%s7473_s3 + $0xa20] ss:$16 sps:$4 sm:$0xff]  }
 0x214   : > { %4183 = vmatpush1.bf16.msra.mxu1 %v5349_v22  ;;  %3938 = vmatprep.subr.bf16.mxu0 %v5354_v25  ;;  %v5427_v22 = vld [vmem:[%s7473_s3 + $0xa28] ss:$16 sps:$4 sm:$0xff]   ;;  %v5432_v25 = vld [vmem:[%s7473_s3 + $0xa44] ss:$16 sps:$4 sm:$0xff]  }
 0x215   : > { %4184 = vmatprep.subr.bf16.mxu1 %v5357_v12  ;;  %v1602_v12 = vrot.slane %v6848_v10, 4 }
 0x217   : > { %3939 = vmatpush1.bf16.msra.mxu0 %v5352_v23  ;;  %v5435_v23 = vld [vmem:[%s7473_s3 + $0xa4c] ss:$16 sps:$4 sm:$0xff]  }
 0x218   : > { %4185 = vmatpush1.bf16.msra.mxu1 %v5355_v37  ;;  %3940 = vmatprep.subr.bf16.mxu0 %v5360_v56  ;;  %v7493_v37 = vmov 0   ;;  %v5430_v56 = vld [vmem:[%s7473_s3 + $0xa40] ss:$16 sps:$4 sm:$0xff]  }
 0x219   : > { %4186 = vmatprep.subr.bf16.mxu1 %v5363_v46  ;;  %v5433_v46 = vld [vmem:[%s7473_s3 + $0xa48] ss:$16 sps:$4 sm:$0xff]  }
 0x21b   : > { %3941 = vmatpush1.bf16.msra.mxu0 %v5358_v5  ;;  %v5438_v5 = vld [vmem:[%s7473_s3 + $0xa64] ss:$16 sps:$4 sm:$0xff]  }
 0x21c   : > { %4187 = vmatpush1.bf16.msra.mxu1 %v5361_v60  ;;  %3942 = vmatprep.subr.bf16.mxu0 %v5366_v24  ;;  %v1603_v60 = vadd.f32 %v1602_v12, %v6848_v10  ;;  %v5441_v24 = vld [vmem:[%s7473_s3 + $0xa6c] ss:$16 sps:$4 sm:$0xff]   ;;  %v5444_v10 = vld [vmem:[%s7473_s3 + $0xa84] ss:$16 sps:$4 sm:$0xff]  }
 0x21d   : > { %4188 = vmatprep.subr.bf16.mxu1 %v5369_v4  ;;  %v5436_v4 = vld [vmem:[%s7473_s3 + $0xa60] ss:$16 sps:$4 sm:$0xff]  }
 0x21f   : > { %3943 = vmatpush1.bf16.msra.mxu0 %v5364_v40  ;;  %v5439_v40 = vld [vmem:[%s7473_s3 + $0xa68] ss:$16 sps:$4 sm:$0xff]  }
 0x220   : > { %4189 = vmatpush1.bf16.msra.mxu1 %v5367_v21  ;;  %3944 = vmatprep.subr.bf16.mxu0 %v5372_v38  ;;  %v1604_v21 = vrot.slane %v1603_v60, 2  ;;  %v5447_v38 = vld [vmem:[%s7473_s3 + $0xa8c] ss:$16 sps:$4 sm:$0xff]  }
 0x221   : > { %4190 = vmatprep.subr.bf16.mxu1 %v5375_v14  ;;  %v5442_v14 = vld [vmem:[%s7473_s3 + $0xa80] ss:$16 sps:$4 sm:$0xff]  }
 0x223   : > { %3945 = vmatpush1.bf16.msra.mxu0 %v5370_v16  ;;  %v5445_v16 = vld [vmem:[%s7473_s3 + $0xa88] ss:$16 sps:$4 sm:$0xff]  }
 0x224   : > { %4191 = vmatpush1.bf16.msra.mxu1 %v5373_v7  ;;  %3946 = vmatprep.subr.bf16.mxu0 %v5378_v52  ;;  %v5450_v7 = vld [vmem:[%s7473_s3 + $0xaa4] ss:$16 sps:$4 sm:$0xff]   ;;  %v1605_v52 = vadd.f32 %v1604_v21, %v1603_v60 }
 0x225   : > { %4192 = vmatprep.subr.bf16.mxu1 %v5381_v31  ;;  %v5453_v31 = vld [vmem:[%s7473_s3 + $0xaac] ss:$16 sps:$4 sm:$0xff]  }
 0x227   : > { %3947 = vmatpush1.bf16.msra.mxu0 %v5376_v39  ;;  %v5448_v39 = vld [vmem:[%s7473_s3 + $0xaa0] ss:$16 sps:$4 sm:$0xff]  }
 0x228   : > { %4193 = vmatpush1.bf16.msra.mxu1 %v5379_v9  ;;  %3948 = vmatprep.subr.bf16.mxu0 %v5384_v63  ;;  %v5456_v9 = vld [vmem:[%s7473_s3 + $0xac4] ss:$16 sps:$4 sm:$0xff]   ;;  %v1606_v63 = vrot.slane %v1605_v52, 1 }
 0x229   : > { %4194 = vmatprep.subr.bf16.mxu1 %v5387_v20  ;;  %v5459_v20 = vld [vmem:[%s7473_s3 + $0xacc] ss:$16 sps:$4 sm:$0xff]  }
 0x22b   : > { %3949 = vmatpush1.bf16.msra.mxu0 %v5382_v27  ;;  %v5454_v27 = vld [vmem:[%s7473_s3 + $0xac0] ss:$16 sps:$4 sm:$0xff]  }
 0x22c   : > { %4195 = vmatpush1.bf16.msra.mxu1 %v5385_v61  ;;  %3950 = vmatprep.subr.bf16.mxu0 %v5390_v28  ;;  %v5462_v61 = vld [vmem:[%s7473_s3 + $0xae4] ss:$16 sps:$4 sm:$0xff]   ;;  %v1607_v28 = vadd.f32 %v1606_v63, %v1605_v52 }
 0x22d   : > { %4196 = vmatprep.subr.bf16.mxu1 %v5393_v48  ;;  %v5465_v48 = vld [vmem:[%s7473_s3 + $0xaec] ss:$16 sps:$4 sm:$0xff]  }
 0x22f   : > { %3951 = vmatpush1.bf16.msra.mxu0 %v5388_v57  ;;  %v5460_v57 = vld [vmem:[%s7473_s3 + $0xae0] ss:$16 sps:$4 sm:$0xff]  }
 0x230   : > { %4197 = vmatpush1.bf16.msra.mxu1 %v5391_v8  ;;  %3952 = vmatprep.subr.bf16.mxu0 %v5396_v26  ;;  %v5463_v8 = vld [vmem:[%s7473_s3 + $0xae8] ss:$16 sps:$4 sm:$0xff]   ;;  %v1618_v26 = vmul.f32 0.015625, %v1607_v28 }
 0x231   : > { %4198 = vmatprep.subr.bf16.mxu1 %v5399_v51  ;;  %v1982_v51 = vld [vmem:[%s7474_s4] sm:$0xf] }
 0x232   : > { %v1629_v59 = vpack.c.bf16 %v1618_v26, %v1618_v26  ;;  %v3755_v58 = vrot.slane %v1982_v51, %v6059_v35 }
 0x233   : > { %3953 = vmatpush1.bf16.msra.mxu0 %v5394_v41  ;;  %v5667_v41 = vmov 1966171168  }
 0x234   : > { %4199 = vmatpush1.bf16.msra.mxu1 %v5397_v1  ;;  %3954 = vmatprep.subr.bf16.mxu0 %v5402_v47  ;;  %v4263_v1 = vunpack.c.l.s4 %v5667_v41  ;;  %v3747_v47 = vrot.slane %v1982_v51, %v6048_v32 }
 0x235   : > { %4200 = vmatprep.subr.bf16.mxu1 %v5405_v6  ;;  %v3751_v6 = vrot.slane %v1982_v51, %v6056_v34 }
 0x237   : > { %3955 = vmatpush1.bf16.msra.mxu0 %v5400_v50  ;;  %v4264_v50 = vunpack.c.0.s8 %v4263_v1 }
 0x238   : > { %4201 = vmatpush1.bf16.msra.mxu1 %v5403_v53  ;;  %3956 = vmatprep.subr.bf16.mxu0 %v5408_v29  ;;  %v7494_v53 = vld [vmem:[#allocation3_spill] sm:$0xff] }
 0x239   : > { %4202 = vmatprep.subr.bf16.mxu1 %v5411_v19  ;;  %v7495_v29 = vsub.s32 3, %v7494_v53 }
 0x23b   : > { %3957 = vmatpush1.bf16.msra.mxu0 %v5406_v49  ;;  %v3759_v43 = vrot.slane %v1982_v51, %v7495_v29 }
 0x23c   : > { %4203 = vmatpush1.bf16.msra.mxu1 %v5409_v0  ;;  %3958 = vmatprep.subr.bf16.mxu0 %v5414_v11 }
 0x23d   : > { %4204 = vmatprep.subr.bf16.mxu1 %v5417_v17 }
 0x23f   : > { %3959 = vmatpush1.bf16.msra.mxu0 %v5412_v42  ;;  %v4267_v42 = vsub.s32 %v4264_v50, %v7494_v53 }
 0x240   : > { %4205 = vmatpush1.bf16.msra.mxu1 %v5415_v3  ;;  %3969 = vmatprep.subr.bf16.mxu0 %v5420_v62 }
 0x241   : > { %4215 = vmatprep.subr.bf16.mxu1 %v5423_v33 }
 0x242   : > { %3961 = vmatmul.mubr.bf16.vlgmr.msra.gmra.mrb[48].mxu0 %v1627_v30 }
 0x243   : > { %4207 = vmatmul.mubr.bf16.vlgmr.msra.gmra.mrb[40].mxu1 %v1627_v30  ;;  %3970 = vmatpush1.bf16.msra.mxu0 %v5418_v18 }
 0x244   : > { %4216 = vmatpush1.bf16.msra.mxu1 %v5421_v13  ;;  %3971 = vmatprep.subr.bf16.mxu0 %v5426_v36 }
 0x245   : > { %4217 = vmatprep.subr.bf16.mxu1 %v5429_v44  ;;  %4001 = vmatprep.mubr.bf16.mxu0 %v7493_v37  ;;  %v7496_v44 = vlaneseq }
 0x246   : > { %4247 = vmatprep.mubr.bf16.mxu1 %v7493_v37 }
 0x247   : > { %3972 = vmatpush1.bf16.msra.mxu0 %v5424_v55  ;;  %vm4287_vm1 = vcmp.lt.s32.totalorder %v7496_v44, 512 }
 0x248   : > { %4218 = vmatpush1.bf16.msra.mxu1 %v5427_v22  ;;  %3973 = vmatprep.subr.bf16.mxu0 %v5432_v25 }
 0x249   : > { %4219 = vmatprep.subr.bf16.mxu1 %v5435_v23 }
 0x24b   : > { %3974 = vmatpush1.bf16.msra.mxu0 %v5430_v56 }
 0x24c   : > { %4220 = vmatpush1.bf16.msra.mxu1 %v5433_v46  ;;  %3975 = vmatprep.subr.bf16.mxu0 %v5438_v5 }
 0x24d   : > { %4221 = vmatprep.subr.bf16.mxu1 %v5441_v24 }
 0x24f   : > { %3976 = vmatpush1.bf16.msra.mxu0 %v5436_v4 }
 0x250   : > { %4222 = vmatpush1.bf16.msra.mxu1 %v5439_v40  ;;  %3977 = vmatprep.subr.bf16.mxu0 %v5444_v10 }
 0x251   : > { %4223 = vmatprep.subr.bf16.mxu1 %v5447_v38 }
 0x253   : > { %3978 = vmatpush1.bf16.msra.mxu0 %v5442_v14 }
 0x254   : > { %4224 = vmatpush1.bf16.msra.mxu1 %v5445_v16  ;;  %3979 = vmatprep.subr.bf16.mxu0 %v5450_v7 }
 0x255   : > { %4225 = vmatprep.subr.bf16.mxu1 %v5453_v31 }
 0x257   : > { %3980 = vmatpush1.bf16.msra.mxu0 %v5448_v39 }
 0x258   : > { %4226 = vmatpush1.bf16.msra.mxu1 %v5451_v2  ;;  %3981 = vmatprep.subr.bf16.mxu0 %v5456_v9 }
 0x259   : > { %4227 = vmatprep.subr.bf16.mxu1 %v5459_v20 }
 0x25b   : > { %3982 = vmatpush1.bf16.msra.mxu0 %v5454_v27 }
 0x25c   : > { %4228 = vmatpush1.bf16.msra.mxu1 %v5457_v15  ;;  %3983 = vmatprep.subr.bf16.mxu0 %v5462_v61 }
 0x25d   : > { %4229 = vmatprep.subr.bf16.mxu1 %v5465_v48 }
 0x25f   : > { %3984 = vmatpush1.bf16.msra.mxu0 %v5460_v57 }
 0x260   : > { %4230 = vmatpush1.bf16.msra.mxu1 %v5463_v8 }
 0x262   : > { %4002 = vmatmul.mubr.bf16.vlgmr.msra.gmra.mrb[48].mxu0 %v1629_v59 }
 0x263   : > { %4248 = vmatmul.mubr.bf16.vlgmr.msra.gmra.mrb[40].mxu1 %v1629_v59 }
 0x335   : > { %v4003_v19 = vpop.f32.mrb[48].mxu0 }
 0x336   : > { %v4832_v49 = vadd.f32 %v4003_v19, %v3747_v47  ;;  %v4249_v0 = vpop.f32.mrb[40].mxu1  ;;  %v4005_v11 = vpop.f32.mrb[49].mxu0 }
 0x337   : > { %v4834_v45 = vadd.f32 %v4249_v0, %v3755_v58  ;;  %v4833_v17 = vadd.f32 %v4005_v11, %v3751_v6  ;;  %v4251_v3 = vpop.f32.mrb[41].mxu1  ;;  %v4007_v54 = vpop.f32.mrb[50].mxu0 }
 0x338   : > { %v4835_v32 = vadd.f32 %v4251_v3, %v3759_v43  ;;  %v4253_v62 = vpop.f32.mrb[42].mxu1  ;;  %v4008_v35 = vpop.f32.mrb[51].mxu0 }
 0x339   : > { %v4260_v33 = vcombine.low %v4832_v49, %v4833_v17  ;;  %v4254_v34 = vpop.f32.mrb[43].mxu1 }
 0x33a   : > { %v4261_v18 = vcombine.low %v4834_v45, %v4835_v32 }
 0x33b   : > { %v4268_v30 = vrot.slane %v4260_v33, %v4267_v42 }
 0x33c   : > { %v4275_v13 = vrot.slane %v4261_v18, %v4267_v42 }
 0x33e   : > { %v4276_v36 = vcombine.low %v4268_v30, %v4275_v13 }
 0x340   : > { %v4283_v55 = vrot.slane %v4276_v36, %v4267_v42 }
 0x342   : > { %4289 = vst.msk [vmem:[%s250_s27] sm:$0xf] %vm4287_vm1, %v4283_v55 }
 0x343 PF: > { %s15_s20 = sadd.s32 1, %s5664_s20   ;;  %s7497_s18 = smov %s5660_s19 }
 0x344   : > { %p12_p5 = scmp.ge.s32.totalorder %s15_s20, 6   ;;  %s7498_s19 = smov %s7500_s21 }
 0x346   :  { %14 = sbr.rel (!%p12_p5) target bundleno = 2 (0x2), region = 78 }

</bundles_post_ra>
